<compile_context>
chip_gen: v6e
topology: v6e:2x2x1
jax: 0.10.0
libtpu: 0.0.40
codegen_flags: <defaults>
</compile_context>

<pallas_src>
import jax
import jax.numpy as jnp
from jax import lax
from jax.experimental import pallas as pl
from jax.experimental.pallas import tpu as pltpu


# -----------------------------------------------------------------------------
# Fused Pallas kernel: all LSTM layers (wavefronted) + FC head in one call
# -----------------------------------------------------------------------------
def _make_fused_kernel(num_layers, T, B, H, fc_as_reduction, matmul_dtype):
    """Ref layout (positional):
      refs[0]                  : x_flat   (T*B, D)   time-major rows, row = t*B+b
      refs[1+3l : 4+3l], l<L   : (w_ih_t (D_l,4H), w_hh_t (H,4H), bias (1,4H))
                                 gate columns repacked to [i|f|o|g]
      refs[1+3L], refs[2+3L]   : fc_w, fc_b
      refs[3+3L]               : o_ref    (B, O)
      refs[4+3L]               : gx0 scratch (T*B, 4H)
    """
    L = num_layers
    f32 = jnp.float32

    def _cell(gates, c_prev):
        # gates columns are [i | f | o | g]:
        #   one contiguous sigmoid pass over 3H lanes + one tanh pass over H lanes.
        sig = jax.nn.sigmoid(gates[:, : 3 * H])
        g_g = jnp.tanh(gates[:, 3 * H:])
        i_g = sig[:, 0 * H:1 * H]
        f_g = sig[:, 1 * H:2 * H]
        o_g = sig[:, 2 * H:3 * H]
        c_new = f_g * c_prev + i_g * g_g
        h_new = o_g * jnp.tanh(c_new)
        return h_new, c_new

    def kernel(*refs):
        x_ref = refs[0]
        layer_refs = [(refs[1 + 3 * l], refs[2 + 3 * l], refs[3 + 3 * l])
                      for l in range(L)]
        fc_w_ref = refs[1 + 3 * L]
        fc_b_ref = refs[2 + 3 * L]
        o_ref = refs[3 + 3 * L]
        gx0_scr = refs[4 + 3 * L]

        # ---- Load weights once, hoist bias broadcasts out of the time loop ----
        w_ih, w_hh, bias_b = [], [], []
        for l in range(L):
            wih_ref, whh_ref, b_ref = layer_refs[l]
            w_ih.append(wih_ref[...].astype(matmul_dtype))
            w_hh.append(whh_ref[...].astype(matmul_dtype))
            bias_b.append(jnp.broadcast_to(b_ref[...], (B, 4 * H)))

        # ---- Layer-0 input projection: ONE flat (T*B, D) x (D, 4H) matmul ----
        # (bias folded once; entirely off the serial recurrence chain)
        gx0_scr[...] = (
            jnp.dot(x_ref[...].astype(matmul_dtype), w_ih[0],
                    preferred_element_type=f32)
            + layer_refs[0][2][...]
        )

        # ---- Wavefronted recurrence; h/c stay in vregs (SSA), not VMEM ----
        h = [jnp.zeros((B, H), f32) for _ in range(L)]  # h0 = 0 (PyTorch forward)
        c = [jnp.zeros((B, H), f32) for _ in range(L)]  # c0 = 0

        # TODO(synk): for large T use a bounded-unroll lax.fori_loop or a T-chunk
        # grid axis instead of this full static unroll.
        for t in range(T):
            # layer 0: input projection comes from precomputed gx0
            gates0 = (
                gx0_scr[pl.ds(t * B, B), :]
                + jnp.dot(h[0].astype(matmul_dtype), w_hh[0],
                          preferred_element_type=f32)
            )
            h[0], c[0] = _cell(gates0, c[0])

            # layers l>=1 consume layer l-1's h at the SAME timestep; their
            # matmuls are independent of layer 0's next-step matmul, so the
            # unrolled stream lets the MXU pipeline across the layer wavefront.
            for l in range(1, L):
                gates = (
                    jnp.dot(h[l - 1].astype(matmul_dtype), w_ih[l],
                            preferred_element_type=f32)
                    + jnp.dot(h[l].astype(matmul_dtype), w_hh[l],
                              preferred_element_type=f32)
                    + bias_b[l]
                )
                h[l], c[l] = _cell(gates, c[l])

        # ---- FC head epilogue (h_last never leaves VMEM/vregs) ----
        h_last = h[L - 1]  # == out[:, -1, :] of the top layer
        if fc_as_reduction:
            # output_size == 1: VPU multiply + lane reduce instead of an (H,1)
            # MXU matmul. fc_w_ref is (1, H), fc_b_ref is (1, 1).
            out = (jnp.sum(h_last * fc_w_ref[...], axis=-1, keepdims=True)
                   + fc_b_ref[...])
        else:
            out = (jnp.dot(h_last, fc_w_ref[...], preferred_element_type=f32)
                   + fc_b_ref[...])
        o_ref[...] = out.astype(o_ref.dtype)

    return kernel


# -----------------------------------------------------------------------------
# Wrapper
# -----------------------------------------------------------------------------
def _repack_ifgo_to_ifog(a):
    """Permute gate columns (last axis) from PyTorch [i|f|g|o] to [i|f|o|g]."""
    i, f, g, o = jnp.split(a, 4, axis=-1)
    return jnp.concatenate([i, f, o, g], axis=-1)


def lstm_model_forward(x_btd, params, matmul_dtype=jnp.float32):
    """Pallas implementation of LSTMModel.forward.

    x_btd: (B, T, input_size), batch_first like the PyTorch module.
    Returns: (B, output_size).
    matmul_dtype: pass jnp.bfloat16 on v6e/v7x for 2x MXU throughput + half the
    weight/activation VMEM footprint (state/accumulation stay f32).
    """
    B, T, D = x_btd.shape
    L = len(params["lstm"])
    H = params["lstm"][0]["w_hh_t"].shape[0]
    O = params["fc_w_t"].shape[1]
    fc_as_reduction = (O == 1)

    # Flatten to time-major rows (row = t*B + b) so the kernel's layer-0 input
    # projection is a single dense (T*B, D) x (D, 4H) matmul.
    # TODO(synk): at production scale avoid this materialized transpose by
    # computing gx0 in XLA (einsum('btd,dg->tbg') + b) or by reading (B,T,D)
    # through a T-chunk BlockSpec index_map once a time grid exists.
    x_flat = jnp.transpose(x_btd, (1, 0, 2)).reshape(T * B, D).astype(jnp.float32)

    # For the O==1 reduction path pass the FC weight as a (1, H) row.
    fc_w_arg = params["fc_w_t"].T if fc_as_reduction else params["fc_w_t"]

    args = [x_flat]
    for layer in params["lstm"]:
        args.extend([
            _repack_ifgo_to_ifog(layer["w_ih_t"]),
            _repack_ifgo_to_ifog(layer["w_hh_t"]),
            _repack_ifgo_to_ifog(layer["bias"]),
        ])
    args.extend([fc_w_arg, params["fc_b"]])

    kernel = _make_fused_kernel(L, T, B, H, fc_as_reduction, matmul_dtype)
    vmem = pl.BlockSpec(memory_space=pltpu.MemorySpace.VMEM)

    return pl.pallas_call(
        kernel,
        out_shape=jax.ShapeDtypeStruct((B, O), jnp.float32),
        in_specs=[vmem] * len(args),
        out_specs=vmem,
        scratch_shapes=[
            # gx0: layer-0 input projections, flat & sublane-dense (T*B, 4H).
            pltpu.VMEM((T * B, 4 * H), jnp.float32),
        ],
    )(*args)


# -----------------------------------------------------------------------------
# Deterministic parameter init (PyTorch-style uniform(-1/sqrt(H), 1/sqrt(H)))
# -----------------------------------------------------------------------------
def init_params(key, input_size, hidden_size, num_layers, output_size):
    k = 1.0 / jnp.sqrt(hidden_size)
    params = {"lstm": []}
    for layer in range(num_layers):
        d_in = input_size if layer == 0 else hidden_size
        key, k1, k2, k3, k4 = jax.random.split(key, 5)
        # PyTorch stores weight_ih as (4H, d_in), gate rows [i|f|g|o]; pre-transpose.
        w_ih = jax.random.uniform(k1, (4 * hidden_size, d_in), jnp.float32, -k, k)
        w_hh = jax.random.uniform(k2, (4 * hidden_size, hidden_size), jnp.float32, -k, k)
        b_ih = jax.random.uniform(k3, (4 * hidden_size,), jnp.float32, -k, k)
        b_hh = jax.random.uniform(k4, (4 * hidden_size,), jnp.float32, -k, k)
        params["lstm"].append({
            "w_ih_t": w_ih.T,                 # (d_in, 4H), columns [i|f|g|o]
            "w_hh_t": w_hh.T,                 # (H, 4H),   columns [i|f|g|o]
            "bias": (b_ih + b_hh)[None, :],   # (1, 4H)
        })
    key, k5, k6 = jax.random.split(key, 3)
    fc_w = jax.random.uniform(k5, (output_size, hidden_size), jnp.float32, -k, k)
    fc_b = jax.random.uniform(k6, (output_size,), jnp.float32, -k, k)
    params["fc_w_t"] = fc_w.T                 # (H, O)
    params["fc_b"] = fc_b[None, :]            # (1, O)
    return params


# -----------------------------------------------------------------------------
# Pure-JAX reference (PyTorch gate order; for correctness checking only)
# -----------------------------------------------------------------------------
def reference_forward(x_btd, params):
    H = params["lstm"][0]["w_hh_t"].shape[0]
    x = jnp.transpose(x_btd, (1, 0, 2)).astype(jnp.float32)  # (T, B, D)
    for layer in params["lstm"]:
        T, B, _ = x.shape
        gx = jnp.einsum("tbd,dg->tbg", x, layer["w_ih_t"]) + layer["bias"]
        h = jnp.zeros((B, H), jnp.float32)
        c = jnp.zeros((B, H), jnp.float32)

        def step(carry, gx_t, w_hh_t=layer["w_hh_t"]):
            h, c = carry
            gates = gx_t + h @ w_hh_t
            i = jax.nn.sigmoid(gates[:, 0 * H:1 * H])
            f = jax.nn.sigmoid(gates[:, 1 * H:2 * H])
            g = jnp.tanh(gates[:, 2 * H:3 * H])
            o = jax.nn.sigmoid(gates[:, 3 * H:4 * H])
            c = f * c + i * g
            h = o * jnp.tanh(c)
            return (h, c), h

        (_, _), ys = lax.scan(step, (h, c), gx)
        x = ys
    return x[-1] @ params["fc_w_t"] + params["fc_b"]


# -----------------------------------------------------------------------------
# Main
# -----------------------------------------------------------------------------
if __name__ == "__main__":
    B, T = 2, 8
    input_size, hidden_size, num_layers, output_size = 16, 32, 2, 1

    key = jax.random.PRNGKey(0)
    key, xk = jax.random.split(key)
    x = jax.random.normal(xk, (B, T, input_size), jnp.float32)

    params = init_params(key, input_size, hidden_size, num_layers, output_size)

    out = jax.block_until_ready(lstm_model_forward(x, params))

    ref = reference_forward(x, params)
    assert out.shape == (B, output_size)
    assert jnp.allclose(out, ref, atol=1e-4, rtol=1e-4), "Pallas output mismatch vs JAX reference"

    print("KERNEL_OK")
</pallas_src>

<mosaic_0001>
module attributes {stable_mosaic.version = 11 : i64} {
  func.func @kernel(%arg0: memref<16x16xf32, #tpu.memory_space<vmem>>, %arg1: memref<16x128xf32, #tpu.memory_space<vmem>>, %arg2: memref<32x128xf32, #tpu.memory_space<vmem>>, %arg3: memref<1x128xf32, #tpu.memory_space<vmem>>, %arg4: memref<32x128xf32, #tpu.memory_space<vmem>>, %arg5: memref<32x128xf32, #tpu.memory_space<vmem>>, %arg6: memref<1x128xf32, #tpu.memory_space<vmem>>, %arg7: memref<1x32xf32, #tpu.memory_space<vmem>>, %arg8: memref<1x1xf32, #tpu.memory_space<vmem>>, %arg9: memref<2x1xf32, #tpu.memory_space<vmem>>, %arg10: memref<16x128xf32, #tpu.memory_space<vmem>>) attributes {dimension_semantics = [], scalar_prefetch = 0 : i64, scratch_operands = 1 : i64, tpu.core_type = #tpu.core_type<tc>} {
    %c0 = arith.constant 0 : index
    %c0_0 = arith.constant 0 : index
    %0 = vector.load %arg1[%c0, %c0_0] : memref<16x128xf32, #tpu.memory_space<vmem>>, vector<16x128xf32>
    %c0_1 = arith.constant 0 : index
    %c0_2 = arith.constant 0 : index
    %1 = vector.load %arg2[%c0_1, %c0_2] : memref<32x128xf32, #tpu.memory_space<vmem>>, vector<32x128xf32>
    %c0_3 = arith.constant 0 : index
    %c0_4 = arith.constant 0 : index
    %2 = vector.load %arg4[%c0_3, %c0_4] : memref<32x128xf32, #tpu.memory_space<vmem>>, vector<32x128xf32>
    %c0_5 = arith.constant 0 : index
    %c0_6 = arith.constant 0 : index
    %3 = vector.load %arg5[%c0_5, %c0_6] : memref<32x128xf32, #tpu.memory_space<vmem>>, vector<32x128xf32>
    %c0_7 = arith.constant 0 : index
    %c0_8 = arith.constant 0 : index
    %4 = vector.load %arg6[%c0_7, %c0_8] : memref<1x128xf32, #tpu.memory_space<vmem>>, vector<1x128xf32>
    %5 = vector.shape_cast %4 : vector<1x128xf32> to vector<1x128xf32>
    %6 = vector.broadcast %5 : vector<1x128xf32> to vector<2x128xf32>
    %c0_9 = arith.constant 0 : index
    %c0_10 = arith.constant 0 : index
    %7 = vector.load %arg0[%c0_9, %c0_10] : memref<16x16xf32, #tpu.memory_space<vmem>>, vector<16x16xf32>
    %cst = arith.constant dense<0.000000e+00> : vector<16x128xf32>
    %8 = tpu.matmul %7, %0, %cst {dimension_numbers = #tpu.dot_dimension_numbers<[1], [0], [0], [1], [0, 0, 1, 1], [], []>} : vector<16x16xf32>, vector<16x128xf32>, vector<16x128xf32> -> vector<16x128xf32>
    %c0_11 = arith.constant 0 : index
    %c0_12 = arith.constant 0 : index
    %9 = vector.load %arg3[%c0_11, %c0_12] : memref<1x128xf32, #tpu.memory_space<vmem>>, vector<1x128xf32>
    %10 = vector.broadcast %9 : vector<1x128xf32> to vector<16x128xf32>
    %11 = arith.addf %8, %10 : vector<16x128xf32>
    %c0_13 = arith.constant 0 : index
    %c0_14 = arith.constant 0 : index
    %12 = vector.load %arg10[%c0_13, %c0_14] : memref<16x128xf32, #tpu.memory_space<vmem>>, vector<16x128xf32>
    tpu.vector_store %arg10[%c0_13, %c0_14], %11 {strides = array<i32>} : memref<16x128xf32, #tpu.memory_space<vmem>>, vector<16x128xf32>,
    %cst_15 = arith.constant 0.000000e+00 : f32
    %13 = vector.broadcast %cst_15 : f32 to vector<2x32xf32>
    %cst_16 = arith.constant 0.000000e+00 : f32
    %14 = vector.broadcast %cst_16 : f32 to vector<2x32xf32>
    %cst_17 = arith.constant 0.000000e+00 : f32
    %15 = vector.broadcast %cst_17 : f32 to vector<2x32xf32>
    %cst_18 = arith.constant 0.000000e+00 : f32
    %16 = vector.broadcast %cst_18 : f32 to vector<2x32xf32>
    %c0_19 = arith.constant 0 : index
    %c0_20 = arith.constant 0 : index
    %17 = vector.load %arg10[%c0_19, %c0_20] : memref<16x128xf32, #tpu.memory_space<vmem>>, vector<2x128xf32>
    %cst_21 = arith.constant dense<0.000000e+00> : vector<2x128xf32>
    %18 = tpu.matmul %13, %1, %cst_21 {dimension_numbers = #tpu.dot_dimension_numbers<[1], [0], [0], [1], [0, 0, 1, 1], [], []>} : vector<2x32xf32>, vector<32x128xf32>, vector<2x128xf32> -> vector<2x128xf32>
    %19 = arith.addf %17, %18 : vector<2x128xf32>
    %20 = vector.extract_strided_slice %19 {offsets = [0, 0], sizes = [2, 96], strides = [1, 1]} : vector<2x128xf32> to vector<2x96xf32>
    %21 = arith.negf %20 : vector<2x96xf32>
    %22 = math.exp %21 : vector<2x96xf32>
    %cst_22 = arith.constant 1.000000e+00 : f32
    %23 = vector.broadcast %cst_22 : f32 to vector<2x96xf32>
    %24 = arith.addf %23, %22 : vector<2x96xf32>
    %25 = arith.divf %23, %24 : vector<2x96xf32>
    %26 = vector.extract_strided_slice %19 {offsets = [0, 96], sizes = [2, 32], strides = [1, 1]} : vector<2x128xf32> to vector<2x32xf32>
    %27 = math.tanh %26 : vector<2x32xf32>
    %28 = vector.extract_strided_slice %25 {offsets = [0, 0], sizes = [2, 32], strides = [1, 1]} : vector<2x96xf32> to vector<2x32xf32>
    %29 = vector.extract_strided_slice %25 {offsets = [0, 32], sizes = [2, 32], strides = [1, 1]} : vector<2x96xf32> to vector<2x32xf32>
    %30 = vector.extract_strided_slice %25 {offsets = [0, 64], sizes = [2, 32], strides = [1, 1]} : vector<2x96xf32> to vector<2x32xf32>
    %31 = arith.mulf %29, %15 : vector<2x32xf32>
    %32 = arith.mulf %28, %27 : vector<2x32xf32>
    %33 = arith.addf %31, %32 : vector<2x32xf32>
    %34 = math.tanh %33 : vector<2x32xf32>
    %35 = arith.mulf %30, %34 : vector<2x32xf32>
    %cst_23 = arith.constant dense<0.000000e+00> : vector<2x128xf32>
    %36 = tpu.matmul %35, %2, %cst_23 {dimension_numbers = #tpu.dot_dimension_numbers<[1], [0], [0], [1], [0, 0, 1, 1], [], []>} : vector<2x32xf32>, vector<32x128xf32>, vector<2x128xf32> -> vector<2x128xf32>
    %cst_24 = arith.constant dense<0.000000e+00> : vector<2x128xf32>
    %37 = tpu.matmul %14, %3, %cst_24 {dimension_numbers = #tpu.dot_dimension_numbers<[1], [0], [0], [1], [0, 0, 1, 1], [], []>} : vector<2x32xf32>, vector<32x128xf32>, vector<2x128xf32> -> vector<2x128xf32>
    %38 = arith.addf %36, %37 : vector<2x128xf32>
    %39 = arith.addf %38, %6 : vector<2x128xf32>
    %40 = vector.extract_strided_slice %39 {offsets = [0, 0], sizes = [2, 96], strides = [1, 1]} : vector<2x128xf32> to vector<2x96xf32>
    %41 = arith.negf %40 : vector<2x96xf32>
    %42 = math.exp %41 : vector<2x96xf32>
    %cst_25 = arith.constant 1.000000e+00 : f32
    %43 = vector.broadcast %cst_25 : f32 to vector<2x96xf32>
    %44 = arith.addf %43, %42 : vector<2x96xf32>
    %45 = arith.divf %43, %44 : vector<2x96xf32>
    %46 = vector.extract_strided_slice %39 {offsets = [0, 96], sizes = [2, 32], strides = [1, 1]} : vector<2x128xf32> to vector<2x32xf32>
    %47 = math.tanh %46 : vector<2x32xf32>
    %48 = vector.extract_strided_slice %45 {offsets = [0, 0], sizes = [2, 32], strides = [1, 1]} : vector<2x96xf32> to vector<2x32xf32>
    %49 = vector.extract_strided_slice %45 {offsets = [0, 32], sizes = [2, 32], strides = [1, 1]} : vector<2x96xf32> to vector<2x32xf32>
    %50 = vector.extract_strided_slice %45 {offsets = [0, 64], sizes = [2, 32], strides = [1, 1]} : vector<2x96xf32> to vector<2x32xf32>
    %51 = arith.mulf %49, %16 : vector<2x32xf32>
    %52 = arith.mulf %48, %47 : vector<2x32xf32>
    %53 = arith.addf %51, %52 : vector<2x32xf32>
    %54 = math.tanh %53 : vector<2x32xf32>
    %55 = arith.mulf %50, %54 : vector<2x32xf32>
    %c2 = arith.constant 2 : index
    %c0_26 = arith.constant 0 : index
    %56 = vector.load %arg10[%c2, %c0_26] : memref<16x128xf32, #tpu.memory_space<vmem>>, vector<2x128xf32>
    %cst_27 = arith.constant dense<0.000000e+00> : vector<2x128xf32>
    %57 = tpu.matmul %35, %1, %cst_27 {dimension_numbers = #tpu.dot_dimension_numbers<[1], [0], [0], [1], [0, 0, 1, 1], [], []>} : vector<2x32xf32>, vector<32x128xf32>, vector<2x128xf32> -> vector<2x128xf32>
    %58 = arith.addf %56, %57 : vector<2x128xf32>
    %59 = vector.extract_strided_slice %58 {offsets = [0, 0], sizes = [2, 96], strides = [1, 1]} : vector<2x128xf32> to vector<2x96xf32>
    %60 = arith.negf %59 : vector<2x96xf32>
    %61 = math.exp %60 : vector<2x96xf32>
    %cst_28 = arith.constant 1.000000e+00 : f32
    %62 = vector.broadcast %cst_28 : f32 to vector<2x96xf32>
    %63 = arith.addf %62, %61 : vector<2x96xf32>
    %64 = arith.divf %62, %63 : vector<2x96xf32>
    %65 = vector.extract_strided_slice %58 {offsets = [0, 96], sizes = [2, 32], strides = [1, 1]} : vector<2x128xf32> to vector<2x32xf32>
    %66 = math.tanh %65 : vector<2x32xf32>
    %67 = vector.extract_strided_slice %64 {offsets = [0, 0], sizes = [2, 32], strides = [1, 1]} : vector<2x96xf32> to vector<2x32xf32>
    %68 = vector.extract_strided_slice %64 {offsets = [0, 32], sizes = [2, 32], strides = [1, 1]} : vector<2x96xf32> to vector<2x32xf32>
    %69 = vector.extract_strided_slice %64 {offsets = [0, 64], sizes = [2, 32], strides = [1, 1]} : vector<2x96xf32> to vector<2x32xf32>
    %70 = arith.mulf %68, %33 : vector<2x32xf32>
    %71 = arith.mulf %67, %66 : vector<2x32xf32>
    %72 = arith.addf %70, %71 : vector<2x32xf32>
    %73 = math.tanh %72 : vector<2x32xf32>
    %74 = arith.mulf %69, %73 : vector<2x32xf32>
    %cst_29 = arith.constant dense<0.000000e+00> : vector<2x128xf32>
    %75 = tpu.matmul %74, %2, %cst_29 {dimension_numbers = #tpu.dot_dimension_numbers<[1], [0], [0], [1], [0, 0, 1, 1], [], []>} : vector<2x32xf32>, vector<32x128xf32>, vector<2x128xf32> -> vector<2x128xf32>
    %cst_30 = arith.constant dense<0.000000e+00> : vector<2x128xf32>
    %76 = tpu.matmul %55, %3, %cst_30 {dimension_numbers = #tpu.dot_dimension_numbers<[1], [0], [0], [1], [0, 0, 1, 1], [], []>} : vector<2x32xf32>, vector<32x128xf32>, vector<2x128xf32> -> vector<2x128xf32>
    %77 = arith.addf %75, %76 : vector<2x128xf32>
    %78 = arith.addf %77, %6 : vector<2x128xf32>
    %79 = vector.extract_strided_slice %78 {offsets = [0, 0], sizes = [2, 96], strides = [1, 1]} : vector<2x128xf32> to vector<2x96xf32>
    %80 = arith.negf %79 : vector<2x96xf32>
    %81 = math.exp %80 : vector<2x96xf32>
    %cst_31 = arith.constant 1.000000e+00 : f32
    %82 = vector.broadcast %cst_31 : f32 to vector<2x96xf32>
    %83 = arith.addf %82, %81 : vector<2x96xf32>
    %84 = arith.divf %82, %83 : vector<2x96xf32>
    %85 = vector.extract_strided_slice %78 {offsets = [0, 96], sizes = [2, 32], strides = [1, 1]} : vector<2x128xf32> to vector<2x32xf32>
    %86 = math.tanh %85 : vector<2x32xf32>
    %87 = vector.extract_strided_slice %84 {offsets = [0, 0], sizes = [2, 32], strides = [1, 1]} : vector<2x96xf32> to vector<2x32xf32>
    %88 = vector.extract_strided_slice %84 {offsets = [0, 32], sizes = [2, 32], strides = [1, 1]} : vector<2x96xf32> to vector<2x32xf32>
    %89 = vector.extract_strided_slice %84 {offsets = [0, 64], sizes = [2, 32], strides = [1, 1]} : vector<2x96xf32> to vector<2x32xf32>
    %90 = arith.mulf %88, %53 : vector<2x32xf32>
    %91 = arith.mulf %87, %86 : vector<2x32xf32>
    %92 = arith.addf %90, %91 : vector<2x32xf32>
    %93 = math.tanh %92 : vector<2x32xf32>
    %94 = arith.mulf %89, %93 : vector<2x32xf32>
    %c4 = arith.constant 4 : index
    %c0_32 = arith.constant 0 : index
    %95 = vector.load %arg10[%c4, %c0_32] : memref<16x128xf32, #tpu.memory_space<vmem>>, vector<2x128xf32>
    %cst_33 = arith.constant dense<0.000000e+00> : vector<2x128xf32>
    %96 = tpu.matmul %74, %1, %cst_33 {dimension_numbers = #tpu.dot_dimension_numbers<[1], [0], [0], [1], [0, 0, 1, 1], [], []>} : vector<2x32xf32>, vector<32x128xf32>, vector<2x128xf32> -> vector<2x128xf32>
    %97 = arith.addf %95, %96 : vector<2x128xf32>
    %98 = vector.extract_strided_slice %97 {offsets = [0, 0], sizes = [2, 96], strides = [1, 1]} : vector<2x128xf32> to vector<2x96xf32>
    %99 = arith.negf %98 : vector<2x96xf32>
    %100 = math.exp %99 : vector<2x96xf32>
    %cst_34 = arith.constant 1.000000e+00 : f32
    %101 = vector.broadcast %cst_34 : f32 to vector<2x96xf32>
    %102 = arith.addf %101, %100 : vector<2x96xf32>
    %103 = arith.divf %101, %102 : vector<2x96xf32>
    %104 = vector.extract_strided_slice %97 {offsets = [0, 96], sizes = [2, 32], strides = [1, 1]} : vector<2x128xf32> to vector<2x32xf32>
    %105 = math.tanh %104 : vector<2x32xf32>
    %106 = vector.extract_strided_slice %103 {offsets = [0, 0], sizes = [2, 32], strides = [1, 1]} : vector<2x96xf32> to vector<2x32xf32>
    %107 = vector.extract_strided_slice %103 {offsets = [0, 32], sizes = [2, 32], strides = [1, 1]} : vector<2x96xf32> to vector<2x32xf32>
    %108 = vector.extract_strided_slice %103 {offsets = [0, 64], sizes = [2, 32], strides = [1, 1]} : vector<2x96xf32> to vector<2x32xf32>
    %109 = arith.mulf %107, %72 : vector<2x32xf32>
    %110 = arith.mulf %106, %105 : vector<2x32xf32>
    %111 = arith.addf %109, %110 : vector<2x32xf32>
    %112 = math.tanh %111 : vector<2x32xf32>
    %113 = arith.mulf %108, %112 : vector<2x32xf32>
    %cst_35 = arith.constant dense<0.000000e+00> : vector<2x128xf32>
    %114 = tpu.matmul %113, %2, %cst_35 {dimension_numbers = #tpu.dot_dimension_numbers<[1], [0], [0], [1], [0, 0, 1, 1], [], []>} : vector<2x32xf32>, vector<32x128xf32>, vector<2x128xf32> -> vector<2x128xf32>
    %cst_36 = arith.constant dense<0.000000e+00> : vector<2x128xf32>
    %115 = tpu.matmul %94, %3, %cst_36 {dimension_numbers = #tpu.dot_dimension_numbers<[1], [0], [0], [1], [0, 0, 1, 1], [], []>} : vector<2x32xf32>, vector<32x128xf32>, vector<2x128xf32> -> vector<2x128xf32>
    %116 = arith.addf %114, %115 : vector<2x128xf32>
    %117 = arith.addf %116, %6 : vector<2x128xf32>
    %118 = vector.extract_strided_slice %117 {offsets = [0, 0], sizes = [2, 96], strides = [1, 1]} : vector<2x128xf32> to vector<2x96xf32>
    %119 = arith.negf %118 : vector<2x96xf32>
    %120 = math.exp %119 : vector<2x96xf32>
    %cst_37 = arith.constant 1.000000e+00 : f32
    %121 = vector.broadcast %cst_37 : f32 to vector<2x96xf32>
    %122 = arith.addf %121, %120 : vector<2x96xf32>
    %123 = arith.divf %121, %122 : vector<2x96xf32>
    %124 = vector.extract_strided_slice %117 {offsets = [0, 96], sizes = [2, 32], strides = [1, 1]} : vector<2x128xf32> to vector<2x32xf32>
    %125 = math.tanh %124 : vector<2x32xf32>
    %126 = vector.extract_strided_slice %123 {offsets = [0, 0], sizes = [2, 32], strides = [1, 1]} : vector<2x96xf32> to vector<2x32xf32>
    %127 = vector.extract_strided_slice %123 {offsets = [0, 32], sizes = [2, 32], strides = [1, 1]} : vector<2x96xf32> to vector<2x32xf32>
    %128 = vector.extract_strided_slice %123 {offsets = [0, 64], sizes = [2, 32], strides = [1, 1]} : vector<2x96xf32> to vector<2x32xf32>
    %129 = arith.mulf %127, %92 : vector<2x32xf32>
    %130 = arith.mulf %126, %125 : vector<2x32xf32>
    %131 = arith.addf %129, %130 : vector<2x32xf32>
    %132 = math.tanh %131 : vector<2x32xf32>
    %133 = arith.mulf %128, %132 : vector<2x32xf32>
    %c6 = arith.constant 6 : index
    %c0_38 = arith.constant 0 : index
    %134 = vector.load %arg10[%c6, %c0_38] : memref<16x128xf32, #tpu.memory_space<vmem>>, vector<2x128xf32>
    %cst_39 = arith.constant dense<0.000000e+00> : vector<2x128xf32>
    %135 = tpu.matmul %113, %1, %cst_39 {dimension_numbers = #tpu.dot_dimension_numbers<[1], [0], [0], [1], [0, 0, 1, 1], [], []>} : vector<2x32xf32>, vector<32x128xf32>, vector<2x128xf32> -> vector<2x128xf32>
    %136 = arith.addf %134, %135 : vector<2x128xf32>
    %137 = vector.extract_strided_slice %136 {offsets = [0, 0], sizes = [2, 96], strides = [1, 1]} : vector<2x128xf32> to vector<2x96xf32>
    %138 = arith.negf %137 : vector<2x96xf32>
    %139 = math.exp %138 : vector<2x96xf32>
    %cst_40 = arith.constant 1.000000e+00 : f32
    %140 = vector.broadcast %cst_40 : f32 to vector<2x96xf32>
    %141 = arith.addf %140, %139 : vector<2x96xf32>
    %142 = arith.divf %140, %141 : vector<2x96xf32>
    %143 = vector.extract_strided_slice %136 {offsets = [0, 96], sizes = [2, 32], strides = [1, 1]} : vector<2x128xf32> to vector<2x32xf32>
    %144 = math.tanh %143 : vector<2x32xf32>
    %145 = vector.extract_strided_slice %142 {offsets = [0, 0], sizes = [2, 32], strides = [1, 1]} : vector<2x96xf32> to vector<2x32xf32>
    %146 = vector.extract_strided_slice %142 {offsets = [0, 32], sizes = [2, 32], strides = [1, 1]} : vector<2x96xf32> to vector<2x32xf32>
    %147 = vector.extract_strided_slice %142 {offsets = [0, 64], sizes = [2, 32], strides = [1, 1]} : vector<2x96xf32> to vector<2x32xf32>
    %148 = arith.mulf %146, %111 : vector<2x32xf32>
    %149 = arith.mulf %145, %144 : vector<2x32xf32>
    %150 = arith.addf %148, %149 : vector<2x32xf32>
    %151 = math.tanh %150 : vector<2x32xf32>
    %152 = arith.mulf %147, %151 : vector<2x32xf32>
    %cst_41 = arith.constant dense<0.000000e+00> : vector<2x128xf32>
    %153 = tpu.matmul %152, %2, %cst_41 {dimension_numbers = #tpu.dot_dimension_numbers<[1], [0], [0], [1], [0, 0, 1, 1], [], []>} : vector<2x32xf32>, vector<32x128xf32>, vector<2x128xf32> -> vector<2x128xf32>
    %cst_42 = arith.constant dense<0.000000e+00> : vector<2x128xf32>
    %154 = tpu.matmul %133, %3, %cst_42 {dimension_numbers = #tpu.dot_dimension_numbers<[1], [0], [0], [1], [0, 0, 1, 1], [], []>} : vector<2x32xf32>, vector<32x128xf32>, vector<2x128xf32> -> vector<2x128xf32>
    %155 = arith.addf %153, %154 : vector<2x128xf32>
    %156 = arith.addf %155, %6 : vector<2x128xf32>
    %157 = vector.extract_strided_slice %156 {offsets = [0, 0], sizes = [2, 96], strides = [1, 1]} : vector<2x128xf32> to vector<2x96xf32>
    %158 = arith.negf %157 : vector<2x96xf32>
    %159 = math.exp %158 : vector<2x96xf32>
    %cst_43 = arith.constant 1.000000e+00 : f32
    %160 = vector.broadcast %cst_43 : f32 to vector<2x96xf32>
    %161 = arith.addf %160, %159 : vector<2x96xf32>
    %162 = arith.divf %160, %161 : vector<2x96xf32>
    %163 = vector.extract_strided_slice %156 {offsets = [0, 96], sizes = [2, 32], strides = [1, 1]} : vector<2x128xf32> to vector<2x32xf32>
    %164 = math.tanh %163 : vector<2x32xf32>
    %165 = vector.extract_strided_slice %162 {offsets = [0, 0], sizes = [2, 32], strides = [1, 1]} : vector<2x96xf32> to vector<2x32xf32>
    %166 = vector.extract_strided_slice %162 {offsets = [0, 32], sizes = [2, 32], strides = [1, 1]} : vector<2x96xf32> to vector<2x32xf32>
    %167 = vector.extract_strided_slice %162 {offsets = [0, 64], sizes = [2, 32], strides = [1, 1]} : vector<2x96xf32> to vector<2x32xf32>
    %168 = arith.mulf %166, %131 : vector<2x32xf32>
    %169 = arith.mulf %165, %164 : vector<2x32xf32>
    %170 = arith.addf %168, %169 : vector<2x32xf32>
    %171 = math.tanh %170 : vector<2x32xf32>
    %172 = arith.mulf %167, %171 : vector<2x32xf32>
    %c8 = arith.constant 8 : index
    %c0_44 = arith.constant 0 : index
    %173 = vector.load %arg10[%c8, %c0_44] : memref<16x128xf32, #tpu.memory_space<vmem>>, vector<2x128xf32>
    %cst_45 = arith.constant dense<0.000000e+00> : vector<2x128xf32>
    %174 = tpu.matmul %152, %1, %cst_45 {dimension_numbers = #tpu.dot_dimension_numbers<[1], [0], [0], [1], [0, 0, 1, 1], [], []>} : vector<2x32xf32>, vector<32x128xf32>, vector<2x128xf32> -> vector<2x128xf32>
    %175 = arith.addf %173, %174 : vector<2x128xf32>
    %176 = vector.extract_strided_slice %175 {offsets = [0, 0], sizes = [2, 96], strides = [1, 1]} : vector<2x128xf32> to vector<2x96xf32>
    %177 = arith.negf %176 : vector<2x96xf32>
    %178 = math.exp %177 : vector<2x96xf32>
    %cst_46 = arith.constant 1.000000e+00 : f32
    %179 = vector.broadcast %cst_46 : f32 to vector<2x96xf32>
    %180 = arith.addf %179, %178 : vector<2x96xf32>
    %181 = arith.divf %179, %180 : vector<2x96xf32>
    %182 = vector.extract_strided_slice %175 {offsets = [0, 96], sizes = [2, 32], strides = [1, 1]} : vector<2x128xf32> to vector<2x32xf32>
    %183 = math.tanh %182 : vector<2x32xf32>
    %184 = vector.extract_strided_slice %181 {offsets = [0, 0], sizes = [2, 32], strides = [1, 1]} : vector<2x96xf32> to vector<2x32xf32>
    %185 = vector.extract_strided_slice %181 {offsets = [0, 32], sizes = [2, 32], strides = [1, 1]} : vector<2x96xf32> to vector<2x32xf32>
    %186 = vector.extract_strided_slice %181 {offsets = [0, 64], sizes = [2, 32], strides = [1, 1]} : vector<2x96xf32> to vector<2x32xf32>
    %187 = arith.mulf %185, %150 : vector<2x32xf32>
    %188 = arith.mulf %184, %183 : vector<2x32xf32>
    %189 = arith.addf %187, %188 : vector<2x32xf32>
    %190 = math.tanh %189 : vector<2x32xf32>
    %191 = arith.mulf %186, %190 : vector<2x32xf32>
    %cst_47 = arith.constant dense<0.000000e+00> : vector<2x128xf32>
    %192 = tpu.matmul %191, %2, %cst_47 {dimension_numbers = #tpu.dot_dimension_numbers<[1], [0], [0], [1], [0, 0, 1, 1], [], []>} : vector<2x32xf32>, vector<32x128xf32>, vector<2x128xf32> -> vector<2x128xf32>
    %cst_48 = arith.constant dense<0.000000e+00> : vector<2x128xf32>
    %193 = tpu.matmul %172, %3, %cst_48 {dimension_numbers = #tpu.dot_dimension_numbers<[1], [0], [0], [1], [0, 0, 1, 1], [], []>} : vector<2x32xf32>, vector<32x128xf32>, vector<2x128xf32> -> vector<2x128xf32>
    %194 = arith.addf %192, %193 : vector<2x128xf32>
    %195 = arith.addf %194, %6 : vector<2x128xf32>
    %196 = vector.extract_strided_slice %195 {offsets = [0, 0], sizes = [2, 96], strides = [1, 1]} : vector<2x128xf32> to vector<2x96xf32>
    %197 = arith.negf %196 : vector<2x96xf32>
    %198 = math.exp %197 : vector<2x96xf32>
    %cst_49 = arith.constant 1.000000e+00 : f32
    %199 = vector.broadcast %cst_49 : f32 to vector<2x96xf32>
    %200 = arith.addf %199, %198 : vector<2x96xf32>
    %201 = arith.divf %199, %200 : vector<2x96xf32>
    %202 = vector.extract_strided_slice %195 {offsets = [0, 96], sizes = [2, 32], strides = [1, 1]} : vector<2x128xf32> to vector<2x32xf32>
    %203 = math.tanh %202 : vector<2x32xf32>
    %204 = vector.extract_strided_slice %201 {offsets = [0, 0], sizes = [2, 32], strides = [1, 1]} : vector<2x96xf32> to vector<2x32xf32>
    %205 = vector.extract_strided_slice %201 {offsets = [0, 32], sizes = [2, 32], strides = [1, 1]} : vector<2x96xf32> to vector<2x32xf32>
    %206 = vector.extract_strided_slice %201 {offsets = [0, 64], sizes = [2, 32], strides = [1, 1]} : vector<2x96xf32> to vector<2x32xf32>
    %207 = arith.mulf %205, %170 : vector<2x32xf32>
    %208 = arith.mulf %204, %203 : vector<2x32xf32>
    %209 = arith.addf %207, %208 : vector<2x32xf32>
    %210 = math.tanh %209 : vector<2x32xf32>
    %211 = arith.mulf %206, %210 : vector<2x32xf32>
    %c10 = arith.constant 10 : index
    %c0_50 = arith.constant 0 : index
    %212 = vector.load %arg10[%c10, %c0_50] : memref<16x128xf32, #tpu.memory_space<vmem>>, vector<2x128xf32>
    %cst_51 = arith.constant dense<0.000000e+00> : vector<2x128xf32>
    %213 = tpu.matmul %191, %1, %cst_51 {dimension_numbers = #tpu.dot_dimension_numbers<[1], [0], [0], [1], [0, 0, 1, 1], [], []>} : vector<2x32xf32>, vector<32x128xf32>, vector<2x128xf32> -> vector<2x128xf32>
    %214 = arith.addf %212, %213 : vector<2x128xf32>
    %215 = vector.extract_strided_slice %214 {offsets = [0, 0], sizes = [2, 96], strides = [1, 1]} : vector<2x128xf32> to vector<2x96xf32>
    %216 = arith.negf %215 : vector<2x96xf32>
    %217 = math.exp %216 : vector<2x96xf32>
    %cst_52 = arith.constant 1.000000e+00 : f32
    %218 = vector.broadcast %cst_52 : f32 to vector<2x96xf32>
    %219 = arith.addf %218, %217 : vector<2x96xf32>
    %220 = arith.divf %218, %219 : vector<2x96xf32>
    %221 = vector.extract_strided_slice %214 {offsets = [0, 96], sizes = [2, 32], strides = [1, 1]} : vector<2x128xf32> to vector<2x32xf32>
    %222 = math.tanh %221 : vector<2x32xf32>
    %223 = vector.extract_strided_slice %220 {offsets = [0, 0], sizes = [2, 32], strides = [1, 1]} : vector<2x96xf32> to vector<2x32xf32>
    %224 = vector.extract_strided_slice %220 {offsets = [0, 32], sizes = [2, 32], strides = [1, 1]} : vector<2x96xf32> to vector<2x32xf32>
    %225 = vector.extract_strided_slice %220 {offsets = [0, 64], sizes = [2, 32], strides = [1, 1]} : vector<2x96xf32> to vector<2x32xf32>
    %226 = arith.mulf %224, %189 : vector<2x32xf32>
    %227 = arith.mulf %223, %222 : vector<2x32xf32>
    %228 = arith.addf %226, %227 : vector<2x32xf32>
    %229 = math.tanh %228 : vector<2x32xf32>
    %230 = arith.mulf %225, %229 : vector<2x32xf32>
    %cst_53 = arith.constant dense<0.000000e+00> : vector<2x128xf32>
    %231 = tpu.matmul %230, %2, %cst_53 {dimension_numbers = #tpu.dot_dimension_numbers<[1], [0], [0], [1], [0, 0, 1, 1], [], []>} : vector<2x32xf32>, vector<32x128xf32>, vector<2x128xf32> -> vector<2x128xf32>
    %cst_54 = arith.constant dense<0.000000e+00> : vector<2x128xf32>
    %232 = tpu.matmul %211, %3, %cst_54 {dimension_numbers = #tpu.dot_dimension_numbers<[1], [0], [0], [1], [0, 0, 1, 1], [], []>} : vector<2x32xf32>, vector<32x128xf32>, vector<2x128xf32> -> vector<2x128xf32>
    %233 = arith.addf %231, %232 : vector<2x128xf32>
    %234 = arith.addf %233, %6 : vector<2x128xf32>
    %235 = vector.extract_strided_slice %234 {offsets = [0, 0], sizes = [2, 96], strides = [1, 1]} : vector<2x128xf32> to vector<2x96xf32>
    %236 = arith.negf %235 : vector<2x96xf32>
    %237 = math.exp %236 : vector<2x96xf32>
    %cst_55 = arith.constant 1.000000e+00 : f32
    %238 = vector.broadcast %cst_55 : f32 to vector<2x96xf32>
    %239 = arith.addf %238, %237 : vector<2x96xf32>
    %240 = arith.divf %238, %239 : vector<2x96xf32>
    %241 = vector.extract_strided_slice %234 {offsets = [0, 96], sizes = [2, 32], strides = [1, 1]} : vector<2x128xf32> to vector<2x32xf32>
    %242 = math.tanh %241 : vector<2x32xf32>
    %243 = vector.extract_strided_slice %240 {offsets = [0, 0], sizes = [2, 32], strides = [1, 1]} : vector<2x96xf32> to vector<2x32xf32>
    %244 = vector.extract_strided_slice %240 {offsets = [0, 32], sizes = [2, 32], strides = [1, 1]} : vector<2x96xf32> to vector<2x32xf32>
    %245 = vector.extract_strided_slice %240 {offsets = [0, 64], sizes = [2, 32], strides = [1, 1]} : vector<2x96xf32> to vector<2x32xf32>
    %246 = arith.mulf %244, %209 : vector<2x32xf32>
    %247 = arith.mulf %243, %242 : vector<2x32xf32>
    %248 = arith.addf %246, %247 : vector<2x32xf32>
    %249 = math.tanh %248 : vector<2x32xf32>
    %250 = arith.mulf %245, %249 : vector<2x32xf32>
    %c12 = arith.constant 12 : index
    %c0_56 = arith.constant 0 : index
    %251 = vector.load %arg10[%c12, %c0_56] : memref<16x128xf32, #tpu.memory_space<vmem>>, vector<2x128xf32>
    %cst_57 = arith.constant dense<0.000000e+00> : vector<2x128xf32>
    %252 = tpu.matmul %230, %1, %cst_57 {dimension_numbers = #tpu.dot_dimension_numbers<[1], [0], [0], [1], [0, 0, 1, 1], [], []>} : vector<2x32xf32>, vector<32x128xf32>, vector<2x128xf32> -> vector<2x128xf32>
    %253 = arith.addf %251, %252 : vector<2x128xf32>
    %254 = vector.extract_strided_slice %253 {offsets = [0, 0], sizes = [2, 96], strides = [1, 1]} : vector<2x128xf32> to vector<2x96xf32>
    %255 = arith.negf %254 : vector<2x96xf32>
    %256 = math.exp %255 : vector<2x96xf32>
    %cst_58 = arith.constant 1.000000e+00 : f32
    %257 = vector.broadcast %cst_58 : f32 to vector<2x96xf32>
    %258 = arith.addf %257, %256 : vector<2x96xf32>
    %259 = arith.divf %257, %258 : vector<2x96xf32>
    %260 = vector.extract_strided_slice %253 {offsets = [0, 96], sizes = [2, 32], strides = [1, 1]} : vector<2x128xf32> to vector<2x32xf32>
    %261 = math.tanh %260 : vector<2x32xf32>
    %262 = vector.extract_strided_slice %259 {offsets = [0, 0], sizes = [2, 32], strides = [1, 1]} : vector<2x96xf32> to vector<2x32xf32>
    %263 = vector.extract_strided_slice %259 {offsets = [0, 32], sizes = [2, 32], strides = [1, 1]} : vector<2x96xf32> to vector<2x32xf32>
    %264 = vector.extract_strided_slice %259 {offsets = [0, 64], sizes = [2, 32], strides = [1, 1]} : vector<2x96xf32> to vector<2x32xf32>
    %265 = arith.mulf %263, %228 : vector<2x32xf32>
    %266 = arith.mulf %262, %261 : vector<2x32xf32>
    %267 = arith.addf %265, %266 : vector<2x32xf32>
    %268 = math.tanh %267 : vector<2x32xf32>
    %269 = arith.mulf %264, %268 : vector<2x32xf32>
    %cst_59 = arith.constant dense<0.000000e+00> : vector<2x128xf32>
    %270 = tpu.matmul %269, %2, %cst_59 {dimension_numbers = #tpu.dot_dimension_numbers<[1], [0], [0], [1], [0, 0, 1, 1], [], []>} : vector<2x32xf32>, vector<32x128xf32>, vector<2x128xf32> -> vector<2x128xf32>
    %cst_60 = arith.constant dense<0.000000e+00> : vector<2x128xf32>
    %271 = tpu.matmul %250, %3, %cst_60 {dimension_numbers = #tpu.dot_dimension_numbers<[1], [0], [0], [1], [0, 0, 1, 1], [], []>} : vector<2x32xf32>, vector<32x128xf32>, vector<2x128xf32> -> vector<2x128xf32>
    %272 = arith.addf %270, %271 : vector<2x128xf32>
    %273 = arith.addf %272, %6 : vector<2x128xf32>
    %274 = vector.extract_strided_slice %273 {offsets = [0, 0], sizes = [2, 96], strides = [1, 1]} : vector<2x128xf32> to vector<2x96xf32>
    %275 = arith.negf %274 : vector<2x96xf32>
    %276 = math.exp %275 : vector<2x96xf32>
    %cst_61 = arith.constant 1.000000e+00 : f32
    %277 = vector.broadcast %cst_61 : f32 to vector<2x96xf32>
    %278 = arith.addf %277, %276 : vector<2x96xf32>
    %279 = arith.divf %277, %278 : vector<2x96xf32>
    %280 = vector.extract_strided_slice %273 {offsets = [0, 96], sizes = [2, 32], strides = [1, 1]} : vector<2x128xf32> to vector<2x32xf32>
    %281 = math.tanh %280 : vector<2x32xf32>
    %282 = vector.extract_strided_slice %279 {offsets = [0, 0], sizes = [2, 32], strides = [1, 1]} : vector<2x96xf32> to vector<2x32xf32>
    %283 = vector.extract_strided_slice %279 {offsets = [0, 32], sizes = [2, 32], strides = [1, 1]} : vector<2x96xf32> to vector<2x32xf32>
    %284 = vector.extract_strided_slice %279 {offsets = [0, 64], sizes = [2, 32], strides = [1, 1]} : vector<2x96xf32> to vector<2x32xf32>
    %285 = arith.mulf %283, %248 : vector<2x32xf32>
    %286 = arith.mulf %282, %281 : vector<2x32xf32>
    %287 = arith.addf %285, %286 : vector<2x32xf32>
    %288 = math.tanh %287 : vector<2x32xf32>
    %289 = arith.mulf %284, %288 : vector<2x32xf32>
    %c14 = arith.constant 14 : index
    %c0_62 = arith.constant 0 : index
    %290 = vector.load %arg10[%c14, %c0_62] : memref<16x128xf32, #tpu.memory_space<vmem>>, vector<2x128xf32>
    %cst_63 = arith.constant dense<0.000000e+00> : vector<2x128xf32>
    %291 = tpu.matmul %269, %1, %cst_63 {dimension_numbers = #tpu.dot_dimension_numbers<[1], [0], [0], [1], [0, 0, 1, 1], [], []>} : vector<2x32xf32>, vector<32x128xf32>, vector<2x128xf32> -> vector<2x128xf32>
    %292 = arith.addf %290, %291 : vector<2x128xf32>
    %293 = vector.extract_strided_slice %292 {offsets = [0, 0], sizes = [2, 96], strides = [1, 1]} : vector<2x128xf32> to vector<2x96xf32>
    %294 = arith.negf %293 : vector<2x96xf32>
    %295 = math.exp %294 : vector<2x96xf32>
    %cst_64 = arith.constant 1.000000e+00 : f32
    %296 = vector.broadcast %cst_64 : f32 to vector<2x96xf32>
    %297 = arith.addf %296, %295 : vector<2x96xf32>
    %298 = arith.divf %296, %297 : vector<2x96xf32>
    %299 = vector.extract_strided_slice %292 {offsets = [0, 96], sizes = [2, 32], strides = [1, 1]} : vector<2x128xf32> to vector<2x32xf32>
    %300 = math.tanh %299 : vector<2x32xf32>
    %301 = vector.extract_strided_slice %298 {offsets = [0, 0], sizes = [2, 32], strides = [1, 1]} : vector<2x96xf32> to vector<2x32xf32>
    %302 = vector.extract_strided_slice %298 {offsets = [0, 32], sizes = [2, 32], strides = [1, 1]} : vector<2x96xf32> to vector<2x32xf32>
    %303 = vector.extract_strided_slice %298 {offsets = [0, 64], sizes = [2, 32], strides = [1, 1]} : vector<2x96xf32> to vector<2x32xf32>
    %304 = arith.mulf %302, %267 : vector<2x32xf32>
    %305 = arith.mulf %301, %300 : vector<2x32xf32>
    %306 = arith.addf %304, %305 : vector<2x32xf32>
    %307 = math.tanh %306 : vector<2x32xf32>
    %308 = arith.mulf %303, %307 : vector<2x32xf32>
    %cst_65 = arith.constant dense<0.000000e+00> : vector<2x128xf32>
    %309 = tpu.matmul %308, %2, %cst_65 {dimension_numbers = #tpu.dot_dimension_numbers<[1], [0], [0], [1], [0, 0, 1, 1], [], []>} : vector<2x32xf32>, vector<32x128xf32>, vector<2x128xf32> -> vector<2x128xf32>
    %cst_66 = arith.constant dense<0.000000e+00> : vector<2x128xf32>
    %310 = tpu.matmul %289, %3, %cst_66 {dimension_numbers = #tpu.dot_dimension_numbers<[1], [0], [0], [1], [0, 0, 1, 1], [], []>} : vector<2x32xf32>, vector<32x128xf32>, vector<2x128xf32> -> vector<2x128xf32>
    %311 = arith.addf %309, %310 : vector<2x128xf32>
    %312 = arith.addf %311, %6 : vector<2x128xf32>
    %313 = vector.extract_strided_slice %312 {offsets = [0, 0], sizes = [2, 96], strides = [1, 1]} : vector<2x128xf32> to vector<2x96xf32>
    %314 = arith.negf %313 : vector<2x96xf32>
    %315 = math.exp %314 : vector<2x96xf32>
    %cst_67 = arith.constant 1.000000e+00 : f32
    %316 = vector.broadcast %cst_67 : f32 to vector<2x96xf32>
    %317 = arith.addf %316, %315 : vector<2x96xf32>
    %318 = arith.divf %316, %317 : vector<2x96xf32>
    %319 = vector.extract_strided_slice %312 {offsets = [0, 96], sizes = [2, 32], strides = [1, 1]} : vector<2x128xf32> to vector<2x32xf32>
    %320 = math.tanh %319 : vector<2x32xf32>
    %321 = vector.extract_strided_slice %318 {offsets = [0, 0], sizes = [2, 32], strides = [1, 1]} : vector<2x96xf32> to vector<2x32xf32>
    %322 = vector.extract_strided_slice %318 {offsets = [0, 32], sizes = [2, 32], strides = [1, 1]} : vector<2x96xf32> to vector<2x32xf32>
    %323 = vector.extract_strided_slice %318 {offsets = [0, 64], sizes = [2, 32], strides = [1, 1]} : vector<2x96xf32> to vector<2x32xf32>
    %324 = arith.mulf %322, %287 : vector<2x32xf32>
    %325 = arith.mulf %321, %320 : vector<2x32xf32>
    %326 = arith.addf %324, %325 : vector<2x32xf32>
    %327 = math.tanh %326 : vector<2x32xf32>
    %328 = arith.mulf %323, %327 : vector<2x32xf32>
    %c0_68 = arith.constant 0 : index
    %c0_69 = arith.constant 0 : index
    %329 = vector.load %arg7[%c0_68, %c0_69] : memref<1x32xf32, #tpu.memory_space<vmem>>, vector<1x32xf32>
    %330 = vector.broadcast %329 : vector<1x32xf32> to vector<2x32xf32>
    %331 = arith.mulf %328, %330 : vector<2x32xf32>
    %cst_70 = arith.constant dense<0.000000e+00> : vector<2xf32>
    %332 = vector.multi_reduction <add>, %331, %cst_70 [1] : vector<2x32xf32> to vector<2xf32>
    %333 = vector.shape_cast %332 : vector<2xf32> to vector<2x1xf32>
    %c0_71 = arith.constant 0 : index
    %c0_72 = arith.constant 0 : index
    %334 = vector.load %arg8[%c0_71, %c0_72] : memref<1x1xf32, #tpu.memory_space<vmem>>, vector<1x1xf32>
    %335 = vector.broadcast %334 : vector<1x1xf32> to vector<2x1xf32>
    %336 = arith.addf %333, %335 : vector<2x1xf32>
    %c0_73 = arith.constant 0 : index
    %c0_74 = arith.constant 0 : index
    %337 = vector.load %arg9[%c0_73, %c0_74] : memref<2x1xf32, #tpu.memory_space<vmem>>, vector<2x1xf32>
    tpu.vector_store %arg9[%c0_73, %c0_74], %336 {strides = array<i32>} : memref<2x1xf32, #tpu.memory_space<vmem>>, vector<2x1xf32>,
    return
  }
}

</mosaic_0001>

<bundles_post_ra>
// kernel: tpu_custom_call.1
= control target key start
LH: loop header
LB: loop body
LE: loop exit
PB: predicated region body
PF: predicated region fallthrough
CT: control target
= control target key end

     0   :  { %s3628_s0 = inlined_call_operand.hbm [shape: f32[16,16], index: 0, kind: input, shape index: {}]   ;;  %s3629_s1 = inlined_call_operand.hbm [shape: f32[16,128], index: 1, kind: input, shape index: {}]   ;;  %s3630_s2 = inlined_call_operand.hbm [shape: f32[32,128], index: 2, kind: input, shape index: {}]   ;;  %s3631_s3 = inlined_call_operand.vmem [shape: f32[1,128], index: 3, kind: input, shape index: {}]   ;;  %s3632_s4 = inlined_call_operand.hbm [shape: f32[32,128], index: 4, kind: input, shape index: {}]   ;;  %s3633_s5 = inlined_call_operand.hbm [shape: f32[32,128], index: 5, kind: input, shape index: {}]   ;;  %s3634_s6 = inlined_call_operand.vmem [shape: f32[1,128], index: 6, kind: input, shape index: {}]   ;;  %s3635_s7 = inlined_call_operand.vmem [shape: f32[1,32], index: 7, kind: input, shape index: {}]   ;;  %s3636_s8 = inlined_call_operand.<no memory space> [shape: f32[1,1], index: 8, kind: input, shape index: {}]   ;;  %s3637_s9 = inlined_call_operand.vmem [shape: f32[2,1], index: 9, kind: output, shape index: {}]  }
   0x1   :  { %v14_v0 = vstv %s3636_s8 }
   0x2   :  { %15 = vst [vmem:[#allocation3] sm:$0x1] %v14_v0 }
   0x3   :  { %16 = vsyncpa [#allocation5], 0 }
   0x4   :  { %17 = vsyncpa [#allocation7], 0 }
   0x5   :  { %18 = vsyncpa [#allocation10], 0  ;;  %s3115_s11 = smov [#allocation6]   ;;  %s3116_s13 = smov [#allocation9]  }
   0x6   :  { %s36_s12 = sshll.u32 %s3115_s11, 4  ;;  %s62_s14 = sshll.u32 %s3116_s13, 4  ;;  %s37_s12 = int_to_ptr.vmem [resolvable:$true] %s36_s12  ;;  %s63_s14 = int_to_ptr.vmem [resolvable:$true] %s62_s14 }
   0x7   :  { %s3017_s15 = scalar_lea.vmem %s37_s12, 256  ;;  %p3022_p1 = scmp.lt.s32.totalorder %s37_s12, %s37_s12 }
   0x8   :  { %p3018_p0 = scmp.ne.s32.totalorder %s37_s12, %s3017_s15  ;;  %p3023_p2 = scmp.lt.s32.totalorder %s3017_s15, %s3017_s15 }
   0xa   :  { %p3024_p3 = por %p3023_p2, %p3022_p1 }
   0xc   :  { %p3025_p4 = pnand %p3024_p3, %p3018_p0 }
   0xe   :  { %3028 = shalt.err (!%p3025_p4)
}
   0xf   :  { %s3117_s16 = smov 128   ;;  %s3118_s17 = smov 8  }
  0x10   :  { %42 = dma.hbm_to_vmem [thread:$0]  %s3629_s1, 256, %s37_s12, [#allocation7], %s3117_s16, %s3117_s16, %s3118_s17  }
  0x11   :  { %s3037_s19 = scalar_lea.vmem %s63_s14, 512  ;;  %p3042_p6 = scmp.lt.s32.totalorder %s63_s14, %s63_s14 }
  0x12   :  { %p3038_p5 = scmp.ne.s32.totalorder %s63_s14, %s3037_s19  ;;  %p3043_p7 = scmp.lt.s32.totalorder %s3037_s19, %s3037_s19 }
  0x14   :  { %p3044_p8 = por %p3043_p7, %p3042_p6 }
  0x16   :  { %p3045_p9 = pnand %p3044_p8, %p3038_p5 }
  0x18   :  { %3048 = shalt.err (!%p3045_p9)
}
  0x19   :  { %68 = dma.hbm_to_vmem [thread:$0]  %s3632_s4, 512, %s63_s14, [#allocation10], %s3117_s16, %s3117_s16, %s3118_s17  }
  0x1a   :  { %s3119_s22 = smov [#allocation4]   ;;  %s3120_s24 = smov [#allocation8]  }
  0x1b   :  { %s24_s23 = sshll.u32 %s3119_s22, 4  ;;  %s48_s25 = sshll.u32 %s3120_s24, 4  ;;  %s25_s23 = int_to_ptr.vmem [resolvable:$true] %s24_s23  ;;  %s49_s25 = int_to_ptr.vmem [resolvable:$true] %s48_s25 }
  0x1c   :  { %s3057_s1 = scalar_lea.vmem %s25_s23, 256  ;;  %p3062_p11 = scmp.lt.s32.totalorder %s25_s23, %s25_s23 }
  0x1d   :  { %p3058_p10 = scmp.ne.s32.totalorder %s25_s23, %s3057_s1  ;;  %p3063_p12 = scmp.lt.s32.totalorder %s3057_s1, %s3057_s1 }
  0x1f   :  { %p3064_p13 = por %p3063_p12, %p3062_p11 }
  0x21   :  { %p3065_p0 = pnand %p3064_p13, %p3058_p10 }
  0x23   :  { %3068 = shalt.err (!%p3065_p0)
}
  0x24   :  { %30 = dma.hbm_to_vmem [thread:$0]  %s3628_s0, 256, %s25_s23, [#allocation5], %s3117_s16, %s3117_s16, %s3118_s17  }
  0x25   :  { %s3077_s4 = scalar_lea.vmem %s49_s25, 512  ;;  %p3082_p2 = scmp.lt.s32.totalorder %s49_s25, %s49_s25 }
  0x26   :  { %p3078_p1 = scmp.ne.s32.totalorder %s49_s25, %s3077_s4  ;;  %p3083_p3 = scmp.lt.s32.totalorder %s3077_s4, %s3077_s4 }
  0x28   :  { %p3084_p4 = por %p3083_p3, %p3082_p2 }
  0x2a   :  { %p3085_p5 = pnand %p3084_p4, %p3078_p1 }
  0x2c   :  { %3088 = shalt.err (!%p3085_p5)
}
  0x2d   :  { %54 = dma.hbm_to_vmem [thread:$0]  %s3630_s2, 512, %s49_s25, [#allocation7], %s3117_s16, %s3117_s16, %s3118_s17  }
  0x2e   :  { %s3121_s30 = smov [#allocation11]  }
  0x2f   :  { %s74_s10 = sshll.u32 %s3121_s30, 4  ;;  %s75_s10 = int_to_ptr.vmem [resolvable:$true] %s74_s10 }
  0x30   :  { %s3097_s11 = scalar_lea.vmem %s75_s10, 512  ;;  %p3102_p7 = scmp.lt.s32.totalorder %s75_s10, %s75_s10 }
  0x31   :  { %p3098_p6 = scmp.ne.s32.totalorder %s75_s10, %s3097_s11  ;;  %p3103_p8 = scmp.lt.s32.totalorder %s3097_s11, %s3097_s11 }
  0x33   :  { %p3104_p9 = por %p3103_p8, %p3102_p7 }
  0x35   :  { %p3105_p10 = pnand %p3104_p9, %p3098_p6 }
  0x37   :  { %3108 = shalt.err (!%p3105_p10)
}
  0x38   :  { %80 = dma.hbm_to_vmem [thread:$0]  %s3633_s5, 512, %s75_s10, [#allocation10], %s3117_s16, %s3117_s16, %s3118_s17  }
  0x39   :  { %3109 = dma.done.wait [#allocation5], 256  }
  0x3a   :  { %3110 = vsyncadd [#allocation5], 4294967040 }
  0x3b   :  { %3111 = dma.done.wait [#allocation7], 768  }
  0x3c   :  { %3112 = vsyncadd [#allocation7], 4294966528 }
  0x3d   :  { %3113 = dma.done.wait [#allocation10], 1024  }
  0x3e   :  { %3114 = vsyncadd [#allocation10], 4294966272  ;;  %v3122_v1 = vmov 0.0   ;;  %vm3123_vm0 = vmmov 0   ;;  %vm132_vm1 = vcmask 130048   ;;  %v103_v2 = vld [vmem:[#allocation6 + $0x8] sm:$0xff] }
  0x3f   :  { %2593 = vmatprep.subr.mxu1 %v3122_v1  ;;  %2601 = vmatprep.mubr.msk.f32.mxu1 %vm3123_vm0, %v3122_v1  ;;  %v102_v3 = vld [vmem:[#allocation6] sm:$0xff]  ;;  %v123_v4 = vld [vmem:[#allocation4] sm:$0xff]  ;;  %v3213_v5 = vld [vmem:[#allocation8 + $0x18] sm:$0xff]  ;;  %s3124_s13 = smov 32   ;;  %vm217_vm2 = vcmask 261120   ;;  %vm2397_vm3 = vcmask 254976  }
  0x40   :  { %2586 = vmatprep.subr.mxu0 %v103_v2  ;;  %2590 = vmatprep.mubr.msk.f32.mxu0 %vm132_vm1, %v123_v4  ;;  %v3215_v6 = vld [vmem:[#allocation8 + $0x10] sm:$0xff]  ;;  %v124_v7 = vld [vmem:[#allocation4 + $0x8] sm:$0xff]  ;;  %v3224_v9 = vld [vmem:[#allocation8] sm:$0xff]  ;;  %vm2409_vm4 = vcmask 1024  }
  0x41   :  { %2587 = vmatpush3.msra.mxu0 %v103_v2  ;;  %2594 = vmatpush3.msra.mxu1 %v3213_v5  ;;  %v3219_v8 = vld [vmem:[#allocation8 + $0x8] sm:$0xff]  ;;  %v3244_v29 = vld [vmem:[#allocation11 + $0x18] sm:$0xff]  ;;  %v3246_v30 = vld [vmem:[#allocation11 + $0x10] sm:$0xff] }
  0x42   :  { %2588 = vmatprep.subr.mxu0 %v102_v3  ;;  %2595 = vmatprep.subr.mxu1 %v3122_v1  ;;  %v2419_v10 = vld [vmem:[%s3631_s3] ss:$0 sm:$0xff]  ;;  %v3249_v31 = vld [vmem:[#allocation9 + $0x18] sm:$0xff]  ;;  %v3251_v32 = vld [vmem:[#allocation9 + $0x10] sm:$0xff]  ;;  %s3125_s3 = smov 64  }
  0x43   :  { %2589 = vmatpush3.msra.mxu0 %v102_v3  ;;  %2596 = vmatpush3.msra.mxu1 %v3215_v6  ;;  %v3254_v33 = vld [vmem:[#allocation11 + $0x8] sm:$0xff]  ;;  %v3262_v35 = vld [vmem:[#allocation11] sm:$0xff] }
  0x44   :  { %2591 = vmatmul.mubr.msk.f32.vlgmr.msra.gmra.mxu0 %vm132_vm1, %v124_v7  ;;  %2597 = vmatprep.subr.mxu1 %v3122_v1  ;;  %v3259_v34 = vld [vmem:[#allocation9 + $0x8] sm:$0xff]  ;;  %v3269_v36 = vld [vmem:[#allocation9] sm:$0xff] }
  0x45   :  { %2598 = vmatpush3.msra.mxu1 %v3219_v8  ;;  %2604 = vmatprep.subr.mxu0 %v3122_v1  ;;  %v3314_v43 = vld [vmem:[%s3634_s6] ss:$0 sm:$0xff] }
  0x46   :  { %2599 = vmatprep.subr.mxu1 %v3122_v1  ;;  %2612 = vmatprep.mubr.msk.f32.mxu0 %vm3123_vm0, %v3122_v1 }
  0x47   :  { %2600 = vmatpush3.msra.mxu1 %v3224_v9  ;;  %2605 = vmatpush3.msra.mxu0 %v3244_v29 }
  0x48   :  { %2602 = vmatmul.mubr.f32.vlgmr.msra.gmra.mxu1 %v3122_v1  ;;  %2615 = vmatprep.subr.mxu1 %v3122_v1 }
  0x49   :  { %2623 = vmatprep.mubr.msk.f32.mxu1 %vm3123_vm0, %v3122_v1  ;;  %2606 = vmatprep.subr.mxu0 %v3122_v1 }
  0x4a   :  { %2616 = vmatpush3.msra.mxu1 %v3249_v31  ;;  %2607 = vmatpush3.msra.mxu0 %v3246_v30 }
  0x4b   :  { %2617 = vmatprep.subr.mxu1 %v3122_v1  ;;  %2608 = vmatprep.subr.mxu0 %v3122_v1 }
  0x4c   :  { %2618 = vmatpush3.msra.mxu1 %v3251_v32  ;;  %2609 = vmatpush3.msra.mxu0 %v3254_v33 }
  0x4d   :  { %2619 = vmatprep.subr.mxu1 %v3122_v1  ;;  %2610 = vmatprep.subr.mxu0 %v3122_v1 }
  0x4e   :  { %2620 = vmatpush3.msra.mxu1 %v3259_v34  ;;  %2611 = vmatpush3.msra.mxu0 %v3262_v35 }
  0x4f   :  { %2621 = vmatprep.subr.mxu1 %v3122_v1  ;;  %2626 = vmatprep.subr.mxu0 %v3122_v1 }
  0x50   :  { %2613 = vmatmul.mubr.f32.vlgmr.msra.gmra.mxu0 %v3122_v1  ;;  %2622 = vmatpush3.msra.mxu1 %v3269_v36 }
  0x51   :  { %2627 = vmatpush3.msra.mxu0 %v3213_v5  ;;  %2634 = vmatprep.mubr.msk.f32.mxu0 %vm3123_vm0, %v3122_v1 }
  0x52   :  { %2628 = vmatprep.subr.mxu0 %v3122_v1  ;;  %2637 = vmatprep.subr.mxu1 %v3122_v1 }
  0x53   :  { %2629 = vmatpush3.msra.mxu0 %v3215_v6 }
  0x54   :  { %2630 = vmatprep.subr.mxu0 %v3122_v1 }
  0x55   :  { %2631 = vmatpush3.msra.mxu0 %v3219_v8 }
  0x56   :  { %2632 = vmatprep.subr.mxu0 %v3122_v1 }
  0x57   :  { %2633 = vmatpush3.msra.mxu0 %v3224_v9 }
  0x58   :  { %2648 = vmatprep.subr.mxu0 %v3122_v1 }
 0x104   :  { %v2592_v11 = vpop.f32.mrf.mxu0 }
 0x105   :  { %v211_v12 = vadd.f32 %v2592_v11, %v2419_v10 }
 0x106   :  { %v205_v13 = vpop.f32.mrf.mxu0 }
 0x107   :  { %215 = vst [vmem:[#allocation2 + $0x8] sm:$0xff] %v211_v12  ;;  %v206_v14 = vadd.f32 %v2419_v10, %v205_v13 }
 0x108   :  { %v287_v15 = vpop.f32.mrf.mxu1 }
 0x109   :  { %214 = vst [vmem:[#allocation2] sm:$0xff] %v206_v14 }
 0x10a   :  { %v2603_v16 = vpop.f32.mrf.mxu1 }
 0x110   :  { %v216_v17 = vld [vmem:[#allocation2] sm:$0x3]  ;;  %v382_v40 = vpop.f32.mrf.mxu0  ;;  %v486_v45 = vld [vmem:[#allocation2 + $0x2] sm:$0x3] }
 0x111   :  { %v291_v18 = vadd.f32 %v287_v15, %v216_v17 }
 0x112   :  { %v2614_v41 = vpop.f32.mrf.mxu0 }
 0x113   :  { %2868 = vtanh.f32 %v291_v18  ;;  %v2422_v20 = vmul.f32 -1.442695, %v291_v18 }
 0x115   :  { %2870 = vpow2.f32 %v2422_v20 }
 0x120   :  { %v2869_v19 = vpop.eup %2868 }
 0x121   :  { %301 = vrot.lane.b32.xlu0 %v2869_v19, %s3124_s13 }
 0x122   :  { %v2871_v21 = vpop.eup %2870 }
 0x123   :  { %v295_v22 = vadd.f32 1.0, %v2871_v21 }
 0x125   :  { %2872 = vrcp.f32 %v295_v22 }
 0x132   :  { %v2873_v23 = vpop.eup %2872 }
 0x133   :  { %v299_v26 = vmul.f32 0.0, %v2873_v23 }
 0x193   :  { %v302_v24 = vpop.permute.xlu0 %301 }
 0x194   :  { %v304_v25 = vmul.f32 %v2873_v23, %v302_v24 }
 0x196   :  { %306 = vrot.lane.b32.xlu0 %v304_v25, %s3124_s13 }
 0x208   :  { %v307_v27 = vpop.permute.xlu0 %306 }
 0x209   :  { %v3241_v28 = vadd.f32 %v307_v27, %v299_v26  ;;  %v757_v27 = vld [vmem:[#allocation2 + $0x4] sm:$0x3] }
 0x20b   :  { %2874 = vtanh.f32 %v3241_v28 }
 0x218   :  { %v2875_v37 = vpop.eup %2874 }
 0x219   :  { %312 = vrot.lane.b32.xlu1 %v2875_v37, %s3124_s13 }
 0x28b   :  { %v313_v38 = vpop.permute.xlu1 %312 }
 0x28c   :  { %v315_v39 = vmul.f32 %v2873_v23, %v313_v38 }
 0x28e   :  { %387 = vrot.lane.b32.xlu1 %v315_v39, %s3125_s3 }
 0x300   :  { %v388_v42 = vpop.permute.xlu1 %387 }
 0x301   :  { %2624 = vmatmul.mubr.msk.f32.vlgmr.msra.gmra.mxu1 %vm217_vm2, %v388_v42  ;;  %2635 = vmatmul.mubr.msk.f32.vlgmr.msra.gmra.mxu0 %vm217_vm2, %v388_v42 }
 0x302   :  { %2649 = vmatpush3.msra.mxu0 %v3249_v31  ;;  %2638 = vmatpush3.msra.mxu1 %v3244_v29 }
 0x303   :  { %2650 = vmatprep.subr.mxu0 %v3122_v1  ;;  %2639 = vmatprep.subr.mxu1 %v3122_v1 }
 0x304   :  { %2651 = vmatpush3.msra.mxu0 %v3251_v32  ;;  %2640 = vmatpush3.msra.mxu1 %v3246_v30 }
 0x305   :  { %2652 = vmatprep.subr.mxu0 %v3122_v1  ;;  %2641 = vmatprep.subr.mxu1 %v3122_v1 }
 0x306   :  { %2653 = vmatpush3.msra.mxu0 %v3259_v34  ;;  %2642 = vmatpush3.msra.mxu1 %v3254_v33 }
 0x307   :  { %2654 = vmatprep.subr.mxu0 %v3122_v1  ;;  %2656 = vmatprep.mubr.msk.f32.mxu0 %vm3123_vm0, %v3122_v1 }
 0x308   :  { %2655 = vmatpush3.msra.mxu0 %v3269_v36  ;;  %2643 = vmatprep.subr.mxu1 %v3122_v1 }
 0x309   :  { %2644 = vmatpush3.msra.mxu1 %v3262_v35  ;;  %2645 = vmatprep.mubr.msk.f32.mxu1 %vm3123_vm0, %v3122_v1 }
 0x30a   :  { %2659 = vmatprep.subr.mxu1 %v3122_v1  ;;  %2670 = vmatprep.subr.mxu0 %v3122_v1 }
 0x3c1   :  { %v457_v44 = vpop.f32.mrf.mxu1  ;;  %v553_v46 = vpop.f32.mrf.mxu0 }
 0x3c2   :  { %v458_v47 = vadd.f32 %v457_v44, %v382_v40  ;;  %v557_v48 = vadd.f32 %v553_v46, %v486_v45 }
 0x3c3   :  { %v2625_v49 = vpop.f32.mrf.mxu1  ;;  %v2636_v50 = vpop.f32.mrf.mxu0 }
 0x3c4   :  { %v461_v51 = vadd.f32 %v3314_v43, %v458_v47  ;;  %2876 = vtanh.f32 %v557_v48  ;;  %v2426_v54 = vmul.f32 -1.442695, %v557_v48 }
 0x3c6   :  { %2878 = vtanh.f32 %v461_v51  ;;  %v2424_v55 = vmul.f32 -1.442695, %v461_v51 }
 0x3c7   :  { %2880 = vpow2.f32 %v2426_v54 }
 0x3c8   :  { %2882 = vpow2.f32 %v2424_v55 }
 0x3d1   :  { %v2877_v52 = vpop.eup %2876 }
 0x3d2   :  { %567 = vrot.lane.b32.xlu1 %v2877_v52, %s3124_s13 }
 0x3d3   :  { %v2879_v53 = vpop.eup %2878 }
 0x3d4   :  { %471 = vrot.lane.b32.xlu0 %v2879_v53, %s3124_s13  ;;  %v2881_v56 = vpop.eup %2880 }
 0x3d5   :  { %v2883_v57 = vpop.eup %2882  ;;  %v561_v58 = vadd.f32 1.0, %v2881_v56 }
 0x3d6   :  { %v465_v59 = vadd.f32 1.0, %v2883_v57 }
 0x3d7   :  { %2884 = vrcp.f32 %v561_v58 }
 0x3d8   :  { %2886 = vrcp.f32 %v465_v59 }
 0x3e4   :  { %v2885_v60 = vpop.eup %2884 }
 0x3e5   :  { %v2887_v63 = vpop.eup %2886  ;;  %v565_v3 = vmul.f32 %v2885_v60, %v3241_v28 }
 0x3e6   :  { %v469_v10 = vmul.f32 0.0, %v2887_v63 }
 0x444   :  { %v568_v61 = vpop.permute.xlu1 %567 }
 0x445   :  { %v570_v62 = vmul.f32 %v2885_v60, %v568_v61 }
 0x446   :  { %v472_v0 = vpop.permute.xlu0 %471 }
 0x447   :  { %v474_v2 = vmul.f32 %v2887_v63, %v472_v0  ;;  %572 = vrot.lane.b32.xlu1 %v570_v62, %s3124_s13 }
 0x449   :  { %476 = vrot.lane.b32.xlu0 %v474_v2, %s3124_s13 }
 0x4b9   :  { %v573_v4 = vpop.permute.xlu1 %572 }
 0x4ba   :  { %v3322_v7 = vadd.f32 %v573_v4, %v565_v3 }
 0x4bb   :  { %v477_v11 = vpop.permute.xlu0 %476 }
 0x4bc   :  { %2888 = vtanh.f32 %v3322_v7  ;;  %v3325_v12 = vadd.f32 %v477_v11, %v469_v10 }
 0x4be   :  { %2890 = vtanh.f32 %v3325_v12 }
 0x4c9   :  { %v2889_v13 = vpop.eup %2888 }
 0x4ca   :  { %578 = vrot.lane.b32.xlu1 %v2889_v13, %s3124_s13 }
 0x4cb   :  { %v2891_v14 = vpop.eup %2890 }
 0x4cc   :  { %482 = vrot.lane.b32.xlu0 %v2891_v14, %s3124_s13  ;;  %v1028_v14 = vld [vmem:[#allocation2 + $0x6] sm:$0x3] }
 0x53c   :  { %v579_v15 = vpop.permute.xlu1 %578 }
 0x53d   :  { %v581_v16 = vmul.f32 %v2885_v60, %v579_v15 }
 0x53e   :  { %v483_v17 = vpop.permute.xlu0 %482 }
 0x53f   :  { %v485_v18 = vmul.f32 %v2887_v63, %v483_v17  ;;  %658 = vrot.lane.b32.xlu1 %v581_v16, %s3125_s3 }
 0x541   :  { %583 = vrot.lane.b32.xlu0 %v485_v18, %s3125_s3 }
 0x5b1   :  { %v659_v19 = vpop.permute.xlu1 %658 }
 0x5b2   :  { %2657 = vmatmul.mubr.msk.f32.vlgmr.msra.gmra.mxu0 %vm217_vm2, %v659_v19 }
 0x5b3   :  { %v584_v20 = vpop.permute.xlu0 %583  ;;  %2671 = vmatpush3.msra.mxu0 %v3244_v29  ;;  %2678 = vmatprep.mubr.msk.f32.mxu0 %vm3123_vm0, %v3122_v1 }
 0x5b4   :  { %2646 = vmatmul.mubr.msk.f32.vlgmr.msra.gmra.mxu1 %vm217_vm2, %v584_v20  ;;  %2672 = vmatprep.subr.mxu0 %v3122_v1 }
 0x5b5   :  { %2660 = vmatpush3.msra.mxu1 %v3213_v5  ;;  %2667 = vmatprep.mubr.msk.f32.mxu1 %vm3123_vm0, %v3122_v1 }
 0x5b6   :  { %2661 = vmatprep.subr.mxu1 %v3122_v1  ;;  %2673 = vmatpush3.msra.mxu0 %v3246_v30 }
 0x5b7   :  { %2662 = vmatpush3.msra.mxu1 %v3215_v6  ;;  %2674 = vmatprep.subr.mxu0 %v3122_v1 }
 0x5b8   :  { %2663 = vmatprep.subr.mxu1 %v3122_v1  ;;  %2675 = vmatpush3.msra.mxu0 %v3254_v33 }
 0x5b9   :  { %2664 = vmatpush3.msra.mxu1 %v3219_v8  ;;  %2676 = vmatprep.subr.mxu0 %v3122_v1 }
 0x5ba   :  { %2665 = vmatprep.subr.mxu1 %v3122_v1  ;;  %2677 = vmatpush3.msra.mxu0 %v3262_v35 }
 0x5bb   :  { %2666 = vmatpush3.msra.mxu1 %v3224_v9  ;;  %2692 = vmatprep.subr.mxu0 %v3122_v1 }
 0x5bc   :  { %2668 = vmatmul.mubr.msk.f32.vlgmr.msra.gmra.mxu1 %vm217_vm2, %v659_v19  ;;  %2681 = vmatprep.subr.mxu1 %v3122_v1 }
 0x5bd   :  { %2682 = vmatpush3.msra.mxu1 %v3249_v31  ;;  %2689 = vmatprep.mubr.msk.f32.mxu1 %vm3123_vm0, %v3122_v1 }
 0x5be   :  { %2683 = vmatprep.subr.mxu1 %v3122_v1 }
 0x5bf   :  { %2684 = vmatpush3.msra.mxu1 %v3251_v32 }
 0x5c0   :  { %2685 = vmatprep.subr.mxu1 %v3122_v1 }
 0x5c1   :  { %2686 = vmatpush3.msra.mxu1 %v3259_v34 }
 0x5c2   :  { %2687 = vmatprep.subr.mxu1 %v3122_v1 }
 0x5c3   :  { %2688 = vmatpush3.msra.mxu1 %v3269_v36 }
 0x5c4   :  { %2703 = vmatprep.subr.mxu1 %v3122_v1 }
 0x672   :  { %v728_v21 = vpop.f32.mrf.mxu0 }
 0x674   :  { %v653_v22 = vpop.f32.mrf.mxu1  ;;  %v2658_v23 = vpop.f32.mrf.mxu0 }
 0x675   :  { %v729_v24 = vadd.f32 %v728_v21, %v653_v22 }
 0x676   :  { %v2647_v25 = vpop.f32.mrf.mxu1 }
 0x677   :  { %v732_v26 = vadd.f32 %v3314_v43, %v729_v24 }
 0x679   :  { %2892 = vtanh.f32 %v732_v26  ;;  %v2429_v41 = vmul.f32 -1.442695, %v732_v26 }
 0x67c   :  { %v824_v28 = vpop.f32.mrf.mxu1 }
 0x67d   :  { %v828_v37 = vadd.f32 %v824_v28, %v757_v27 }
 0x67e   :  { %v2669_v38 = vpop.f32.mrf.mxu1 }
 0x67f   :  { %2894 = vtanh.f32 %v828_v37  ;;  %v2431_v42 = vmul.f32 -1.442695, %v828_v37 }
 0x680   :  { %2896 = vpow2.f32 %v2429_v41 }
 0x681   :  { %2898 = vpow2.f32 %v2431_v42 }
 0x686   :  { %v2893_v39 = vpop.eup %2892 }
 0x687   :  { %742 = vrot.lane.b32.xlu0 %v2893_v39, %s3124_s13 }
 0x68c   :  { %v2895_v40 = vpop.eup %2894 }
 0x68d   :  { %838 = vrot.lane.b32.xlu1 %v2895_v40, %s3124_s13  ;;  %v2897_v44 = vpop.eup %2896 }
 0x68e   :  { %v736_v45 = vadd.f32 1.0, %v2897_v44  ;;  %v2899_v46 = vpop.eup %2898 }
 0x68f   :  { %v832_v47 = vadd.f32 1.0, %v2899_v46 }
 0x690   :  { %2900 = vrcp.f32 %v736_v45 }
 0x691   :  { %2902 = vrcp.f32 %v832_v47 }
 0x69d   :  { %v2901_v48 = vpop.eup %2900 }
 0x69e   :  { %v2903_v51 = vpop.eup %2902  ;;  %v740_v54 = vmul.f32 %v2901_v48, %v3325_v12 }
 0x69f   :  { %v836_v57 = vmul.f32 %v2903_v51, %v3322_v7 }
 0x6f9   :  { %v743_v49 = vpop.permute.xlu0 %742 }
 0x6fa   :  { %v745_v50 = vmul.f32 %v2901_v48, %v743_v49 }
 0x6fc   :  { %747 = vrot.lane.b32.xlu0 %v745_v50, %s3124_s13 }
 0x6ff   :  { %v839_v52 = vpop.permute.xlu1 %838 }
 0x700   :  { %v841_v53 = vmul.f32 %v2903_v51, %v839_v52 }
 0x702   :  { %843 = vrot.lane.b32.xlu1 %v841_v53, %s3124_s13 }
 0x76e   :  { %v748_v55 = vpop.permute.xlu0 %747 }
 0x76f   :  { %v3371_v56 = vadd.f32 %v748_v55, %v740_v54 }
 0x771   :  { %2904 = vtanh.f32 %v3371_v56 }
 0x774   :  { %v844_v58 = vpop.permute.xlu1 %843 }
 0x775   :  { %v3375_v59 = vadd.f32 %v844_v58, %v836_v57 }
 0x777   :  { %2906 = vtanh.f32 %v3375_v59 }
 0x77e   :  { %v2905_v60 = vpop.eup %2904 }
 0x77f   :  { %753 = vrot.lane.b32.xlu0 %v2905_v60, %s3124_s13 }
 0x784   :  { %v2907_v61 = vpop.eup %2906 }
 0x785   :  { %849 = vrot.lane.b32.xlu1 %v2907_v61, %s3124_s13 }
 0x7f1   :  { %v754_v62 = vpop.permute.xlu0 %753 }
 0x7f2   :  { %v756_v63 = vmul.f32 %v2901_v48, %v754_v62  ;;  %v1299_v62 = vld [vmem:[#allocation2 + $0x8] sm:$0x3] }
 0x7f4   :  { %854 = vrot.lane.b32.xlu0 %v756_v63, %s3125_s3 }
 0x7f7   :  { %v850_v0 = vpop.permute.xlu1 %849 }
 0x7f8   :  { %v852_v2 = vmul.f32 %v2903_v51, %v850_v0 }
 0x7fa   :  { %929 = vrot.lane.b32.xlu1 %v852_v2, %s3125_s3 }
 0x866   :  { %v855_v3 = vpop.permute.xlu0 %854 }
 0x867   :  { %2679 = vmatmul.mubr.msk.f32.vlgmr.msra.gmra.mxu0 %vm217_vm2, %v855_v3 }
 0x868   :  { %2693 = vmatpush3.msra.mxu0 %v3213_v5  ;;  %2700 = vmatprep.mubr.msk.f32.mxu0 %vm3123_vm0, %v3122_v1 }
 0x869   :  { %2694 = vmatprep.subr.mxu0 %v3122_v1 }
 0x86a   :  { %2695 = vmatpush3.msra.mxu0 %v3215_v6 }
 0x86b   :  { %2696 = vmatprep.subr.mxu0 %v3122_v1 }
 0x86c   :  { %2697 = vmatpush3.msra.mxu0 %v3219_v8  ;;  %v930_v4 = vpop.permute.xlu1 %929 }
 0x86d   :  { %2690 = vmatmul.mubr.msk.f32.vlgmr.msra.gmra.mxu1 %vm217_vm2, %v930_v4  ;;  %2698 = vmatprep.subr.mxu0 %v3122_v1 }
 0x86e   :  { %2699 = vmatpush3.msra.mxu0 %v3224_v9  ;;  %2704 = vmatpush3.msra.mxu1 %v3244_v29 }
 0x86f   :  { %2701 = vmatmul.mubr.msk.f32.vlgmr.msra.gmra.mxu0 %vm217_vm2, %v930_v4  ;;  %2714 = vmatprep.subr.mxu0 %v3122_v1 }
 0x870   :  { %2705 = vmatprep.subr.mxu1 %v3122_v1  ;;  %2715 = vmatpush3.msra.mxu0 %v3249_v31 }
 0x871   :  { %2706 = vmatpush3.msra.mxu1 %v3246_v30  ;;  %2716 = vmatprep.subr.mxu0 %v3122_v1 }
 0x872   :  { %2707 = vmatprep.subr.mxu1 %v3122_v1  ;;  %2717 = vmatpush3.msra.mxu0 %v3251_v32 }
 0x873   :  { %2708 = vmatpush3.msra.mxu1 %v3254_v33  ;;  %2718 = vmatprep.subr.mxu0 %v3122_v1 }
 0x874   :  { %2709 = vmatprep.subr.mxu1 %v3122_v1  ;;  %2719 = vmatpush3.msra.mxu0 %v3259_v34 }
 0x875   :  { %2710 = vmatpush3.msra.mxu1 %v3262_v35  ;;  %2720 = vmatprep.subr.mxu0 %v3122_v1 }
 0x876   :  { %2721 = vmatpush3.msra.mxu0 %v3269_v36  ;;  %2722 = vmatprep.mubr.msk.f32.mxu0 %vm3123_vm0, %v3122_v1 }
 0x877   :  { %2711 = vmatprep.mubr.msk.f32.mxu1 %vm3123_vm0, %v3122_v1  ;;  %2725 = vmatprep.subr.mxu1 %v3122_v1 }
 0x878   :  { %2736 = vmatprep.subr.mxu0 %v3122_v1 }
 0x927   :  { %v924_v7 = vpop.f32.mrf.mxu0 }
 0x929   :  { %v2680_v10 = vpop.f32.mrf.mxu0 }
 0x92d   :  { %v999_v11 = vpop.f32.mrf.mxu1 }
 0x92e   :  { %v1000_v12 = vadd.f32 %v999_v11, %v924_v7 }
 0x92f   :  { %v2691_v13 = vpop.f32.mrf.mxu1  ;;  %v1095_v15 = vpop.f32.mrf.mxu0 }
 0x930   :  { %v1003_v16 = vadd.f32 %v3314_v43, %v1000_v12  ;;  %v1099_v17 = vadd.f32 %v1095_v15, %v1028_v14 }
 0x931   :  { %v2702_v18 = vpop.f32.mrf.mxu0 }
 0x932   :  { %2908 = vtanh.f32 %v1003_v16  ;;  %v2434_v21 = vmul.f32 -1.442695, %v1003_v16  ;;  %v2436_v22 = vmul.f32 -1.442695, %v1099_v17 }
 0x933   :  { %2910 = vtanh.f32 %v1099_v17 }
 0x934   :  { %2912 = vpow2.f32 %v2434_v21 }
 0x935   :  { %2914 = vpow2.f32 %v2436_v22 }
 0x93f   :  { %v2909_v19 = vpop.eup %2908 }
 0x940   :  { %v2911_v20 = vpop.eup %2910  ;;  %1013 = vrot.lane.b32.xlu0 %v2909_v19, %s3124_s13 }
 0x941   :  { %1109 = vrot.lane.b32.xlu1 %v2911_v20, %s3124_s13  ;;  %v2913_v23 = vpop.eup %2912 }
 0x942   :  { %v2915_v24 = vpop.eup %2914  ;;  %v1007_v25 = vadd.f32 1.0, %v2913_v23 }
 0x943   :  { %v1103_v26 = vadd.f32 1.0, %v2915_v24 }
 0x944   :  { %2916 = vrcp.f32 %v1007_v25 }
 0x945   :  { %2918 = vrcp.f32 %v1103_v26 }
 0x951   :  { %v2917_v27 = vpop.eup %2916 }
 0x952   :  { %v2919_v37 = vpop.eup %2918  ;;  %v1011_v41 = vmul.f32 %v2917_v27, %v3371_v56 }
 0x953   :  { %v1107_v42 = vmul.f32 %v2919_v37, %v3375_v59 }
 0x9b2   :  { %v1014_v28 = vpop.permute.xlu0 %1013 }
 0x9b3   :  { %v1110_v38 = vpop.permute.xlu1 %1109  ;;  %v1016_v39 = vmul.f32 %v2917_v27, %v1014_v28 }
 0x9b4   :  { %v1112_v40 = vmul.f32 %v2919_v37, %v1110_v38 }
 0x9b5   :  { %1018 = vrot.lane.b32.xlu0 %v1016_v39, %s3124_s13 }
 0x9b6   :  { %1114 = vrot.lane.b32.xlu1 %v1112_v40, %s3124_s13 }
 0xa27   :  { %v1019_v44 = vpop.permute.xlu0 %1018 }
 0xa28   :  { %v1115_v45 = vpop.permute.xlu1 %1114  ;;  %v3422_v46 = vadd.f32 %v1019_v44, %v1011_v41 }
 0xa29   :  { %v3424_v47 = vadd.f32 %v1115_v45, %v1107_v42 }
 0xa2a   :  { %2920 = vtanh.f32 %v3422_v46 }
 0xa2b   :  { %2922 = vtanh.f32 %v3424_v47 }
 0xa37   :  { %v2921_v48 = vpop.eup %2920 }
 0xa38   :  { %v2923_v49 = vpop.eup %2922  ;;  %1024 = vrot.lane.b32.xlu0 %v2921_v48, %s3124_s13 }
 0xa39   :  { %1120 = vrot.lane.b32.xlu1 %v2923_v49, %s3124_s13 }
 0xaaa   :  { %v1025_v50 = vpop.permute.xlu0 %1024 }
 0xaab   :  { %v1121_v51 = vpop.permute.xlu1 %1120  ;;  %v1027_v52 = vmul.f32 %v2917_v27, %v1025_v50  ;;  %v1570_v50 = vld [vmem:[#allocation2 + $0xa] sm:$0x3] }
 0xaac   :  { %v1123_v53 = vmul.f32 %v2919_v37, %v1121_v51 }
 0xaad   :  { %1125 = vrot.lane.b32.xlu0 %v1027_v52, %s3125_s3 }
 0xaae   :  { %1200 = vrot.lane.b32.xlu1 %v1123_v53, %s3125_s3 }
 0xb1f   :  { %v1126_v54 = vpop.permute.xlu0 %1125 }
 0xb20   :  { %v1201_v55 = vpop.permute.xlu1 %1200  ;;  %2712 = vmatmul.mubr.msk.f32.vlgmr.msra.gmra.mxu1 %vm217_vm2, %v1126_v54 }
 0xb21   :  { %2723 = vmatmul.mubr.msk.f32.vlgmr.msra.gmra.mxu0 %vm217_vm2, %v1201_v55  ;;  %2726 = vmatpush3.msra.mxu1 %v3213_v5 }
 0xb22   :  { %2727 = vmatprep.subr.mxu1 %v3122_v1  ;;  %2733 = vmatprep.mubr.msk.f32.mxu1 %vm3123_vm0, %v3122_v1 }
 0xb23   :  { %2728 = vmatpush3.msra.mxu1 %v3215_v6  ;;  %2737 = vmatpush3.msra.mxu0 %v3244_v29 }
 0xb24   :  { %2729 = vmatprep.subr.mxu1 %v3122_v1  ;;  %2738 = vmatprep.subr.mxu0 %v3122_v1 }
 0xb25   :  { %2730 = vmatpush3.msra.mxu1 %v3219_v8  ;;  %2739 = vmatpush3.msra.mxu0 %v3246_v30 }
 0xb26   :  { %2731 = vmatprep.subr.mxu1 %v3122_v1  ;;  %2740 = vmatprep.subr.mxu0 %v3122_v1 }
 0xb27   :  { %2732 = vmatpush3.msra.mxu1 %v3224_v9  ;;  %2741 = vmatpush3.msra.mxu0 %v3254_v33 }
 0xb28   :  { %2734 = vmatmul.mubr.msk.f32.vlgmr.msra.gmra.mxu1 %vm217_vm2, %v1201_v55  ;;  %2742 = vmatprep.subr.mxu0 %v3122_v1 }
 0xb29   :  { %2747 = vmatprep.subr.mxu1 %v3122_v1  ;;  %2743 = vmatpush3.msra.mxu0 %v3262_v35 }
 0xb2a   :  { %2748 = vmatpush3.msra.mxu1 %v3249_v31  ;;  %2744 = vmatprep.mubr.msk.f32.mxu0 %vm3123_vm0, %v3122_v1 }
 0xb2b   :  { %2749 = vmatprep.subr.mxu1 %v3122_v1  ;;  %2758 = vmatprep.subr.mxu0 %v3122_v1 }
 0xb2c   :  { %2750 = vmatpush3.msra.mxu1 %v3251_v32  ;;  %2755 = vmatprep.mubr.msk.f32.mxu1 %vm3123_vm0, %v3122_v1 }
 0xb2d   :  { %2751 = vmatprep.subr.mxu1 %v3122_v1 }
 0xb2e   :  { %2752 = vmatpush3.msra.mxu1 %v3259_v34 }
 0xb2f   :  { %2753 = vmatprep.subr.mxu1 %v3122_v1 }
 0xb30   :  { %2754 = vmatpush3.msra.mxu1 %v3269_v36 }
 0xb31   :  { %2769 = vmatprep.subr.mxu1 %v3122_v1 }
 0xbe0   :  { %v1195_v56 = vpop.f32.mrf.mxu1 }
 0xbe1   :  { %v1270_v57 = vpop.f32.mrf.mxu0 }
 0xbe2   :  { %v1271_v58 = vadd.f32 %v1270_v57, %v1195_v56  ;;  %v2713_v59 = vpop.f32.mrf.mxu1 }
 0xbe3   :  { %v2724_v60 = vpop.f32.mrf.mxu0 }
 0xbe4   :  { %v1274_v61 = vadd.f32 %v3314_v43, %v1271_v58 }
 0xbe6   :  { %2924 = vtanh.f32 %v1274_v61  ;;  %v2439_v7 = vmul.f32 -1.442695, %v1274_v61 }
 0xbe8   :  { %v1366_v63 = vpop.f32.mrf.mxu1 }
 0xbe9   :  { %v1370_v0 = vadd.f32 %v1366_v63, %v1299_v62 }
 0xbea   :  { %v2735_v2 = vpop.f32.mrf.mxu1 }
 0xbeb   :  { %2926 = vtanh.f32 %v1370_v0  ;;  %v2441_v10 = vmul.f32 -1.442695, %v1370_v0 }
 0xbec   :  { %2928 = vpow2.f32 %v2439_v7 }
 0xbed   :  { %2930 = vpow2.f32 %v2441_v10 }
 0xbf3   :  { %v2925_v3 = vpop.eup %2924 }
 0xbf4   :  { %1284 = vrot.lane.b32.xlu0 %v2925_v3, %s3124_s13 }
 0xbf8   :  { %v2927_v4 = vpop.eup %2926 }
 0xbf9   :  { %1380 = vrot.lane.b32.xlu1 %v2927_v4, %s3124_s13  ;;  %v2929_v11 = vpop.eup %2928 }
 0xbfa   :  { %v1278_v12 = vadd.f32 1.0, %v2929_v11  ;;  %v2931_v13 = vpop.eup %2930 }
 0xbfb   :  { %v1374_v14 = vadd.f32 1.0, %v2931_v13 }
 0xbfc   :  { %2932 = vrcp.f32 %v1278_v12 }
 0xbfd   :  { %2934 = vrcp.f32 %v1374_v14 }
 0xc09   :  { %v2933_v15 = vpop.eup %2932 }
 0xc0a   :  { %v2935_v18 = vpop.eup %2934  ;;  %v1282_v21 = vmul.f32 %v2933_v15, %v3422_v46 }
 0xc0b   :  { %v1378_v24 = vmul.f32 %v2935_v18, %v3424_v47 }
 0xc66   :  { %v1285_v16 = vpop.permute.xlu0 %1284 }
 0xc67   :  { %v1287_v17 = vmul.f32 %v2933_v15, %v1285_v16 }
 0xc69   :  { %1289 = vrot.lane.b32.xlu0 %v1287_v17, %s3124_s13 }
 0xc6b   :  { %v1381_v19 = vpop.permute.xlu1 %1380 }
 0xc6c   :  { %v1383_v20 = vmul.f32 %v2935_v18, %v1381_v19 }
 0xc6e   :  { %1385 = vrot.lane.b32.xlu1 %v1383_v20, %s3124_s13 }
 0xcdb   :  { %v1290_v22 = vpop.permute.xlu0 %1289 }
 0xcdc   :  { %v3471_v23 = vadd.f32 %v1290_v22, %v1282_v21 }
 0xcde   :  { %2936 = vtanh.f32 %v3471_v23 }
 0xce0   :  { %v1386_v25 = vpop.permute.xlu1 %1385 }
 0xce1   :  { %v3475_v26 = vadd.f32 %v1386_v25, %v1378_v24 }
 0xce3   :  { %2938 = vtanh.f32 %v3475_v26 }
 0xceb   :  { %v2937_v27 = vpop.eup %2936 }
 0xcec   :  { %1295 = vrot.lane.b32.xlu0 %v2937_v27, %s3124_s13 }
 0xcf0   :  { %v2939_v28 = vpop.eup %2938 }
 0xcf1   :  { %1391 = vrot.lane.b32.xlu1 %v2939_v28, %s3124_s13 }
 0xd5e   :  { %v1296_v37 = vpop.permute.xlu0 %1295 }
 0xd5f   :  { %v1298_v38 = vmul.f32 %v2933_v15, %v1296_v37 }
 0xd61   :  { %1396 = vrot.lane.b32.xlu0 %v1298_v38, %s3125_s3 }
 0xd63   :  { %v1392_v39 = vpop.permute.xlu1 %1391 }
 0xd64   :  { %v1394_v40 = vmul.f32 %v2935_v18, %v1392_v39 }
 0xd66   :  { %1471 = vrot.lane.b32.xlu1 %v1394_v40, %s3125_s3 }
 0xdd3   :  { %v1397_v41 = vpop.permute.xlu0 %1396 }
 0xdd4   :  { %2745 = vmatmul.mubr.msk.f32.vlgmr.msra.gmra.mxu0 %vm217_vm2, %v1397_v41 }
 0xdd5   :  { %2759 = vmatpush3.msra.mxu0 %v3213_v5  ;;  %2766 = vmatprep.mubr.msk.f32.mxu0 %vm3123_vm0, %v3122_v1 }
 0xdd6   :  { %2760 = vmatprep.subr.mxu0 %v3122_v1 }
 0xdd7   :  { %2761 = vmatpush3.msra.mxu0 %v3215_v6 }
 0xdd8   :  { %2762 = vmatprep.subr.mxu0 %v3122_v1  ;;  %v1472_v42 = vpop.permute.xlu1 %1471 }
 0xdd9   :  { %2763 = vmatpush3.msra.mxu0 %v3219_v8  ;;  %2756 = vmatmul.mubr.msk.f32.vlgmr.msra.gmra.mxu1 %vm217_vm2, %v1472_v42 }
 0xdda   :  { %2764 = vmatprep.subr.mxu0 %v3122_v1  ;;  %2770 = vmatpush3.msra.mxu1 %v3244_v29 }
 0xddb   :  { %2765 = vmatpush3.msra.mxu0 %v3224_v9  ;;  %2771 = vmatprep.subr.mxu1 %v3122_v1 }
 0xddc   :  { %2767 = vmatmul.mubr.msk.f32.vlgmr.msra.gmra.mxu0 %vm217_vm2, %v1472_v42  ;;  %2780 = vmatprep.subr.mxu0 %v3122_v1 }
 0xddd   :  { %2781 = vmatpush3.msra.mxu0 %v3249_v31  ;;  %2772 = vmatpush3.msra.mxu1 %v3246_v30 }
 0xdde   :  { %2782 = vmatprep.subr.mxu0 %v3122_v1  ;;  %2773 = vmatprep.subr.mxu1 %v3122_v1 }
 0xddf   :  { %2783 = vmatpush3.msra.mxu0 %v3251_v32  ;;  %2774 = vmatpush3.msra.mxu1 %v3254_v33 }
 0xde0   :  { %2784 = vmatprep.subr.mxu0 %v3122_v1  ;;  %2775 = vmatprep.subr.mxu1 %v3122_v1 }
 0xde1   :  { %2785 = vmatpush3.msra.mxu0 %v3259_v34  ;;  %2776 = vmatpush3.msra.mxu1 %v3262_v35 }
 0xde2   :  { %2786 = vmatprep.subr.mxu0 %v3122_v1  ;;  %2788 = vmatprep.mubr.msk.f32.mxu0 %vm3123_vm0, %v3122_v1 }
 0xde3   :  { %2787 = vmatpush3.msra.mxu0 %v3269_v36  ;;  %2777 = vmatprep.mubr.msk.f32.mxu1 %vm3123_vm0, %v3122_v1 }
 0xde4   :  { %2791 = vmatprep.subr.mxu1 %v3122_v1  ;;  %2802 = vmatprep.subr.mxu0 %v3122_v1 }
 0xe94   :  { %v1466_v44 = vpop.f32.mrf.mxu0 }
 0xe96   :  { %v2746_v45 = vpop.f32.mrf.mxu0 }
 0xe99   :  { %v1541_v46 = vpop.f32.mrf.mxu1 }
 0xe9a   :  { %v1542_v47 = vadd.f32 %v1541_v46, %v1466_v44 }
 0xe9b   :  { %v2757_v48 = vpop.f32.mrf.mxu1 }
 0xe9c   :  { %v1545_v49 = vadd.f32 %v3314_v43, %v1542_v47  ;;  %v1637_v51 = vpop.f32.mrf.mxu0 }
 0xe9d   :  { %v1641_v52 = vadd.f32 %v1637_v51, %v1570_v50 }
 0xe9e   :  { %2940 = vtanh.f32 %v1545_v49  ;;  %v2768_v53 = vpop.f32.mrf.mxu0  ;;  %v2444_v56 = vmul.f32 -1.442695, %v1545_v49 }
 0xe9f   :  { %2942 = vtanh.f32 %v1641_v52  ;;  %v2446_v57 = vmul.f32 -1.442695, %v1641_v52 }
 0xea0   :  { %2944 = vpow2.f32 %v2444_v56 }
 0xea1   :  { %2946 = vpow2.f32 %v2446_v57  ;;  %v2996_v57 = vld [vmem:[#allocation8 + $0x18] sm:$0xff] }
 0xeab   :  { %v2941_v54 = vpop.eup %2940 }
 0xeac   :  { %v2943_v55 = vpop.eup %2942  ;;  %1555 = vrot.lane.b32.xlu0 %v2941_v54, %s3124_s13 }
 0xead   :  { %1651 = vrot.lane.b32.xlu1 %v2943_v55, %s3124_s13  ;;  %v2945_v58 = vpop.eup %2944 }
 0xeae   :  { %v2947_v59 = vpop.eup %2946  ;;  %v1549_v60 = vadd.f32 1.0, %v2945_v58  ;;  %v2997_v58 = vld [vmem:[#allocation8 + $0x10] sm:$0xff] }
 0xeaf   :  { %v1645_v61 = vadd.f32 1.0, %v2947_v59 }
 0xeb0   :  { %2948 = vrcp.f32 %v1549_v60  ;;  %v2998_v60 = vld [vmem:[#allocation8 + $0x8] sm:$0xff] }
 0xeb1   :  { %2950 = vrcp.f32 %v1645_v61  ;;  %v2999_v61 = vld [vmem:[#allocation11 + $0x18] sm:$0xff] }
 0xebd   :  { %v2949_v62 = vpop.eup %2948 }
 0xebe   :  { %v2951_v0 = vpop.eup %2950  ;;  %v1553_v7 = vmul.f32 %v2949_v62, %v3471_v23 }
 0xebf   :  { %v1649_v10 = vmul.f32 %v2951_v0, %v3475_v26 }
 0xf1e   :  { %v1556_v63 = vpop.permute.xlu0 %1555 }
 0xf1f   :  { %v1652_v2 = vpop.permute.xlu1 %1651  ;;  %v1558_v3 = vmul.f32 %v2949_v62, %v1556_v63  ;;  %v3001_v63 = vld [vmem:[#allocation9 + $0x18] sm:$0xff] }
 0xf20   :  { %v1654_v4 = vmul.f32 %v2951_v0, %v1652_v2  ;;  %v3003_v2 = vld [vmem:[#allocation9 + $0x10] sm:$0xff] }
 0xf21   :  { %1560 = vrot.lane.b32.xlu0 %v1558_v3, %s3124_s13  ;;  %v3004_v3 = vld [vmem:[#allocation11 + $0x8] sm:$0xff] }
 0xf22   :  { %1656 = vrot.lane.b32.xlu1 %v1654_v4, %s3124_s13  ;;  %v3005_v4 = vld [vmem:[#allocation9 + $0x8] sm:$0xff] }
 0xf93   :  { %v1561_v11 = vpop.permute.xlu0 %1560 }
 0xf94   :  { %v1657_v12 = vpop.permute.xlu1 %1656  ;;  %v3522_v13 = vadd.f32 %v1561_v11, %v1553_v7  ;;  %v3006_v7 = vld [vmem:[#allocation11] sm:$0xff] }
 0xf95   :  { %v3524_v14 = vadd.f32 %v1657_v12, %v1649_v10  ;;  %v3007_v10 = vld [vmem:[#allocation9] sm:$0xff] }
 0xf96   :  { %2952 = vtanh.f32 %v3522_v13 }
 0xf97   :  { %2954 = vtanh.f32 %v3524_v14 }
 0xfa3   :  { %v2953_v15 = vpop.eup %2952 }
 0xfa4   :  { %v2955_v16 = vpop.eup %2954  ;;  %1566 = vrot.lane.b32.xlu0 %v2953_v15, %s3124_s13 }
 0xfa5   :  { %1662 = vrot.lane.b32.xlu1 %v2955_v16, %s3124_s13 }
0x1016   :  { %v1567_v17 = vpop.permute.xlu0 %1566 }
0x1017   :  { %v1663_v18 = vpop.permute.xlu1 %1662  ;;  %v1569_v19 = vmul.f32 %v2949_v62, %v1567_v17  ;;  %v3000_v62 = vld [vmem:[#allocation8] sm:$0xff]  ;;  %v2112_v17 = vld [vmem:[#allocation2 + $0xe] sm:$0x3] }
0x1018   :  { %v1665_v20 = vmul.f32 %v2951_v0, %v1663_v18  ;;  %v3002_v0 = vld [vmem:[#allocation11 + $0x10] sm:$0xff] }
0x1019   :  { %1667 = vrot.lane.b32.xlu0 %v1569_v19, %s3125_s3 }
0x101a   :  { %1742 = vrot.lane.b32.xlu1 %v1665_v20, %s3125_s3 }
0x108b   :  { %v1668_v21 = vpop.permute.xlu0 %1667 }
0x108c   :  { %v1743_v22 = vpop.permute.xlu1 %1742  ;;  %2778 = vmatmul.mubr.msk.f32.vlgmr.msra.gmra.mxu1 %vm217_vm2, %v1668_v21 }
0x108d   :  { %2789 = vmatmul.mubr.msk.f32.vlgmr.msra.gmra.mxu0 %vm217_vm2, %v1743_v22  ;;  %2792 = vmatpush3.msra.mxu1 %v3213_v5 }
0x108e   :  { %2793 = vmatprep.subr.mxu1 %v3122_v1  ;;  %2799 = vmatprep.mubr.msk.f32.mxu1 %vm3123_vm0, %v3122_v1 }
0x108f   :  { %2794 = vmatpush3.msra.mxu1 %v3215_v6  ;;  %2803 = vmatpush3.msra.mxu0 %v3244_v29 }
0x1090   :  { %2795 = vmatprep.subr.mxu1 %v3122_v1  ;;  %2804 = vmatprep.subr.mxu0 %v3122_v1 }
0x1091   :  { %2796 = vmatpush3.msra.mxu1 %v3219_v8  ;;  %2805 = vmatpush3.msra.mxu0 %v3246_v30 }
0x1092   :  { %2797 = vmatprep.subr.mxu1 %v3122_v1  ;;  %2806 = vmatprep.subr.mxu0 %v3122_v1 }
0x1093   :  { %2798 = vmatpush3.msra.mxu1 %v3224_v9  ;;  %2807 = vmatpush3.msra.mxu0 %v3254_v33 }
0x1094   :  { %2800 = vmatmul.mubr.msk.f32.vlgmr.msra.gmra.mxu1 %vm217_vm2, %v1743_v22  ;;  %2808 = vmatprep.subr.mxu0 %v3122_v1 }
0x1095   :  { %2813 = vmatprep.subr.mxu1 %v3122_v1  ;;  %2809 = vmatpush3.msra.mxu0 %v3262_v35 }
0x1096   :  { %2814 = vmatpush3.msra.mxu1 %v3249_v31  ;;  %2810 = vmatprep.mubr.msk.f32.mxu0 %vm3123_vm0, %v3122_v1  ;;  %v1841_v31 = vld [vmem:[#allocation2 + $0xc] sm:$0x3] }
0x1097   :  { %2815 = vmatprep.subr.mxu1 %v3122_v1  ;;  %2824 = vmatprep.subr.mxu0 %v3122_v1 }
0x1098   :  { %2816 = vmatpush3.msra.mxu1 %v3251_v32  ;;  %2821 = vmatprep.mubr.msk.f32.mxu1 %vm3123_vm0, %v3122_v1 }
0x1099   :  { %2817 = vmatprep.subr.mxu1 %v3122_v1 }
0x109a   :  { %2818 = vmatpush3.msra.mxu1 %v3259_v34 }
0x109b   :  { %2819 = vmatprep.subr.mxu1 %v3122_v1 }
0x109c   :  { %2820 = vmatpush3.msra.mxu1 %v3269_v36 }
0x109d   :  { %2835 = vmatprep.subr.mxu1 %v3122_v1 }
0x114c   :  { %v1737_v5 = vpop.f32.mrf.mxu1 }
0x114d   :  { %v1812_v6 = vpop.f32.mrf.mxu0 }
0x114e   :  { %v1813_v8 = vadd.f32 %v1812_v6, %v1737_v5  ;;  %v2779_v9 = vpop.f32.mrf.mxu1 }
0x114f   :  { %v2790_v29 = vpop.f32.mrf.mxu0 }
0x1150   :  { %v1816_v30 = vadd.f32 %v3314_v43, %v1813_v8 }
0x1152   :  { %2956 = vtanh.f32 %v1816_v30  ;;  %v2449_v36 = vmul.f32 -1.442695, %v1816_v30 }
0x1154   :  { %v1908_v32 = vpop.f32.mrf.mxu1 }
0x1155   :  { %v1912_v33 = vadd.f32 %v1908_v32, %v1841_v31 }
0x1156   :  { %v2801_v35 = vpop.f32.mrf.mxu1 }
0x1157   :  { %2958 = vtanh.f32 %v1912_v33  ;;  %v2451_v24 = vmul.f32 -1.442695, %v1912_v33 }
0x1158   :  { %2960 = vpow2.f32 %v2449_v36 }
0x1159   :  { %2962 = vpow2.f32 %v2451_v24 }
0x115f   :  { %v2957_v34 = vpop.eup %2956 }
0x1160   :  { %1826 = vrot.lane.b32.xlu0 %v2957_v34, %s3124_s13 }
0x1164   :  { %v2959_v23 = vpop.eup %2958 }
0x1165   :  { %1922 = vrot.lane.b32.xlu1 %v2959_v23, %s3124_s13  ;;  %v2961_v25 = vpop.eup %2960 }
0x1166   :  { %v1820_v26 = vadd.f32 1.0, %v2961_v25  ;;  %v2963_v27 = vpop.eup %2962 }
0x1167   :  { %v1916_v28 = vadd.f32 1.0, %v2963_v27 }
0x1168   :  { %2964 = vrcp.f32 %v1820_v26 }
0x1169   :  { %2966 = vrcp.f32 %v1916_v28 }
0x1175   :  { %v2965_v37 = vpop.eup %2964 }
0x1176   :  { %v2967_v40 = vpop.eup %2966  ;;  %v1824_v44 = vmul.f32 %v2965_v37, %v3522_v13 }
0x1177   :  { %v1920_v47 = vmul.f32 %v2967_v40, %v3524_v14 }
0x11d2   :  { %v1827_v38 = vpop.permute.xlu0 %1826 }
0x11d3   :  { %v1829_v39 = vmul.f32 %v2965_v37, %v1827_v38 }
0x11d5   :  { %1831 = vrot.lane.b32.xlu0 %v1829_v39, %s3124_s13 }
0x11d7   :  { %v1923_v41 = vpop.permute.xlu1 %1922 }
0x11d8   :  { %v1925_v42 = vmul.f32 %v2967_v40, %v1923_v41 }
0x11da   :  { %1927 = vrot.lane.b32.xlu1 %v1925_v42, %s3124_s13 }
0x1247   :  { %v1832_v45 = vpop.permute.xlu0 %1831 }
0x1248   :  { %v3571_v46 = vadd.f32 %v1832_v45, %v1824_v44 }
0x124a   :  { %2968 = vtanh.f32 %v3571_v46 }
0x124c   :  { %v1928_v48 = vpop.permute.xlu1 %1927 }
0x124d   :  { %v3575_v49 = vadd.f32 %v1928_v48, %v1920_v47 }
0x124f   :  { %2970 = vtanh.f32 %v3575_v49 }
0x1257   :  { %v2969_v50 = vpop.eup %2968 }
0x1258   :  { %1837 = vrot.lane.b32.xlu0 %v2969_v50, %s3124_s13 }
0x125c   :  { %v2971_v51 = vpop.eup %2970 }
0x125d   :  { %1933 = vrot.lane.b32.xlu1 %v2971_v51, %s3124_s13 }
0x12ca   :  { %v1838_v52 = vpop.permute.xlu0 %1837 }
0x12cb   :  { %v1840_v53 = vmul.f32 %v2965_v37, %v1838_v52 }
0x12cd   :  { %1938 = vrot.lane.b32.xlu0 %v1840_v53, %s3125_s3 }
0x12cf   :  { %v1934_v54 = vpop.permute.xlu1 %1933 }
0x12d0   :  { %v1936_v55 = vmul.f32 %v2967_v40, %v1934_v54 }
0x12d2   :  { %2013 = vrot.lane.b32.xlu1 %v1936_v55, %s3125_s3 }
0x133f   :  { %v1939_v56 = vpop.permute.xlu0 %1938 }
0x1340   :  { %2811 = vmatmul.mubr.msk.f32.vlgmr.msra.gmra.mxu0 %vm217_vm2, %v1939_v56 }
0x1341   :  { %2825 = vmatpush3.msra.mxu0 %v2996_v57  ;;  %2832 = vmatprep.mubr.msk.f32.mxu0 %vm3123_vm0, %v3122_v1 }
0x1342   :  { %2826 = vmatprep.subr.mxu0 %v3122_v1 }
0x1343   :  { %2827 = vmatpush3.msra.mxu0 %v2997_v58  ;;  %v2460_v58 = vld [vmem:[%s3635_s7] ss:$0 sm:$0xff] }
0x1344   :  { %2828 = vmatprep.subr.mxu0 %v3122_v1  ;;  %v2014_v59 = vpop.permute.xlu1 %2013 }
0x1345   :  { %2829 = vmatpush3.msra.mxu0 %v2998_v60  ;;  %2822 = vmatmul.mubr.msk.f32.vlgmr.msra.gmra.mxu1 %vm217_vm2, %v2014_v59 }
0x1346   :  { %2830 = vmatprep.subr.mxu0 %v3122_v1  ;;  %2836 = vmatpush3.msra.mxu1 %v2999_v61 }
0x1347   :  { %2831 = vmatpush3.msra.mxu0 %v3000_v62  ;;  %2837 = vmatprep.subr.mxu1 %v3122_v1 }
0x1348   :  { %2833 = vmatmul.mubr.msk.f32.vlgmr.msra.gmra.mxu0 %vm217_vm2, %v2014_v59  ;;  %2846 = vmatprep.subr.mxu0 %v3122_v1 }
0x1349   :  { %2847 = vmatpush3.msra.mxu0 %v3001_v63  ;;  %2838 = vmatpush3.msra.mxu1 %v3002_v0 }
0x134a   :  { %2848 = vmatprep.subr.mxu0 %v3122_v1  ;;  %2839 = vmatprep.subr.mxu1 %v3122_v1 }
0x134b   :  { %2849 = vmatpush3.msra.mxu0 %v3003_v2  ;;  %2840 = vmatpush3.msra.mxu1 %v3004_v3 }
0x134c   :  { %2850 = vmatprep.subr.mxu0 %v3122_v1  ;;  %2841 = vmatprep.subr.mxu1 %v3122_v1 }
0x134d   :  { %2851 = vmatpush3.msra.mxu0 %v3005_v4  ;;  %2854 = vmatprep.mubr.msk.f32.mxu0 %vm3123_vm0, %v3122_v1 }
0x134e   :  { %2852 = vmatprep.subr.mxu0 %v3122_v1  ;;  %2842 = vmatpush3.msra.mxu1 %v3006_v7 }
0x134f   :  { %2853 = vmatpush3.msra.mxu0 %v3007_v10  ;;  %2843 = vmatprep.mubr.msk.f32.mxu1 %vm3123_vm0, %v3122_v1  ;;  %v2461_v10 = vld [vmem:[#allocation3] ss:$0 sm:$0xff] }
0x1400   :  { %v2008_v11 = vpop.f32.mrf.mxu0 }
0x1402   :  { %v2812_v12 = vpop.f32.mrf.mxu0 }
0x1405   :  { %v2083_v13 = vpop.f32.mrf.mxu1 }
0x1406   :  { %v2084_v14 = vadd.f32 %v2083_v13, %v2008_v11 }
0x1407   :  { %v2823_v15 = vpop.f32.mrf.mxu1 }
0x1408   :  { %v2087_v16 = vadd.f32 %v3314_v43, %v2084_v14  ;;  %v2179_v18 = vpop.f32.mrf.mxu0 }
0x1409   :  { %v2183_v19 = vadd.f32 %v2179_v18, %v2112_v17 }
0x140a   :  { %2972 = vtanh.f32 %v2087_v16  ;;  %v2834_v20 = vpop.f32.mrf.mxu0  ;;  %v2454_v1 = vmul.f32 -1.442695, %v2087_v16 }
0x140b   :  { %2974 = vtanh.f32 %v2183_v19  ;;  %v2456_v5 = vmul.f32 -1.442695, %v2183_v19 }
0x140c   :  { %2976 = vpow2.f32 %v2454_v1 }
0x140d   :  { %2978 = vpow2.f32 %v2456_v5 }
0x1417   :  { %v2973_v21 = vpop.eup %2972 }
0x1418   :  { %v2975_v22 = vpop.eup %2974  ;;  %2097 = vrot.lane.b32.xlu0 %v2973_v21, %s3124_s13 }
0x1419   :  { %2193 = vrot.lane.b32.xlu1 %v2975_v22, %s3124_s13  ;;  %v2977_v6 = vpop.eup %2976 }
0x141a   :  { %v2979_v8 = vpop.eup %2978  ;;  %v2091_v9 = vadd.f32 1.0, %v2977_v6 }
0x141b   :  { %v2187_v43 = vadd.f32 1.0, %v2979_v8 }
0x141c   :  { %2980 = vrcp.f32 %v2091_v9 }
0x141d   :  { %2982 = vrcp.f32 %v2187_v43 }
0x1429   :  { %v2981_v29 = vpop.eup %2980 }
0x142a   :  { %v2983_v31 = vpop.eup %2982  ;;  %v2095_v34 = vmul.f32 %v2981_v29, %v3571_v46 }
0x142b   :  { %v2191_v23 = vmul.f32 %v2983_v31, %v3575_v49  ;;  %v3008_v49 = vld [vmem:[%s3634_s6] ss:$0 sm:$0xff] }
0x148a   :  { %v2098_v30 = vpop.permute.xlu0 %2097 }
0x148b   :  { %v2194_v32 = vpop.permute.xlu1 %2193  ;;  %v2100_v33 = vmul.f32 %v2981_v29, %v2098_v30 }
0x148c   :  { %v2196_v35 = vmul.f32 %v2983_v31, %v2194_v32 }
0x148d   :  { %2102 = vrot.lane.b32.xlu0 %v2100_v33, %s3124_s13 }
0x148e   :  { %2198 = vrot.lane.b32.xlu1 %v2196_v35, %s3124_s13 }
0x14ff   :  { %v2103_v36 = vpop.permute.xlu0 %2102 }
0x1500   :  { %v2199_v24 = vpop.permute.xlu1 %2198  ;;  %v2105_v25 = vadd.f32 %v2103_v36, %v2095_v34 }
0x1501   :  { %v2201_v26 = vadd.f32 %v2199_v24, %v2191_v23 }
0x1502   :  { %2984 = vtanh.f32 %v2105_v25 }
0x1503   :  { %2986 = vtanh.f32 %v2201_v26 }
0x150f   :  { %v2985_v27 = vpop.eup %2984 }
0x1510   :  { %v2987_v28 = vpop.eup %2986  ;;  %2108 = vrot.lane.b32.xlu0 %v2985_v27, %s3124_s13 }
0x1511   :  { %2204 = vrot.lane.b32.xlu1 %v2987_v28, %s3124_s13 }
0x1582   :  { %v2109_v37 = vpop.permute.xlu0 %2108 }
0x1583   :  { %v2205_v38 = vpop.permute.xlu1 %2204  ;;  %v2111_v39 = vmul.f32 %v2981_v29, %v2109_v37 }
0x1584   :  { %v2207_v40 = vmul.f32 %v2983_v31, %v2205_v38 }
0x1585   :  { %2209 = vrot.lane.b32.xlu0 %v2111_v39, %s3125_s3 }
0x1586   :  { %2284 = vrot.lane.b32.xlu1 %v2207_v40, %s3125_s3 }
0x15f7   :  { %v2210_v41 = vpop.permute.xlu0 %2209 }
0x15f8   :  { %v2285_v42 = vpop.permute.xlu1 %2284  ;;  %2844 = vmatmul.mubr.msk.f32.vlgmr.msra.gmra.mxu1 %vm217_vm2, %v2210_v41 }
0x15f9   :  { %2855 = vmatmul.mubr.msk.f32.vlgmr.msra.gmra.mxu0 %vm217_vm2, %v2285_v42 }
0x16b8   :  { %v2279_v44 = vpop.f32.mrf.mxu1 }
0x16b9   :  { %v2354_v45 = vpop.f32.mrf.mxu0 }
0x16ba   :  { %v2355_v46 = vadd.f32 %v2354_v45, %v2279_v44  ;;  %v2845_v47 = vpop.f32.mrf.mxu1 }
0x16bb   :  { %v2856_v48 = vpop.f32.mrf.mxu0 }
0x16bc   :  { %v2358_v50 = vadd.f32 %v3008_v49, %v2355_v46 }
0x16be   :  { %2988 = vtanh.f32 %v2358_v50  ;;  %v2459_v52 = vmul.f32 -1.442695, %v2358_v50 }
0x16c0   :  { %2990 = vpow2.f32 %v2459_v52 }
0x16cb   :  { %v2989_v51 = vpop.eup %2988 }
0x16cc   :  { %2368 = vrot.lane.b32.xlu0 %v2989_v51, %s3124_s13 }
0x16cd   :  { %v2991_v53 = vpop.eup %2990 }
0x16ce   :  { %v2362_v54 = vadd.f32 1.0, %v2991_v53 }
0x16d0   :  { %2992 = vrcp.f32 %v2362_v54 }
0x16dd   :  { %v2993_v55 = vpop.eup %2992 }
0x16de   :  { %v2366_v59 = vmul.f32 %v2993_v55, %v2105_v25 }
0x173e   :  { %v2369_v56 = vpop.permute.xlu0 %2368 }
0x173f   :  { %v2371_v57 = vmul.f32 %v2993_v55, %v2369_v56 }
0x1741   :  { %2373 = vrot.lane.b32.xlu1 %v2371_v57, %s3124_s13 }
0x1745   :  { %2389 = vrot.lane.b32.xlu1 %v2460_v58, %s3125_s3 }
0x17b3   :  { %v2374_v60 = vpop.permute.xlu1 %2373 }
0x17b4   :  { %v2376_v61 = vadd.f32 %v2374_v60, %v2366_v59 }
0x17b6   :  { %2994 = vtanh.f32 %v2376_v61 }
0x17b7   :  { %v2390_v0 = vpop.permute.xlu1 %2389 }
0x17c3   :  { %v2995_v62 = vpop.eup %2994 }
0x17c4   :  { %2379 = vrot.lane.b32.xlu0 %v2995_v62, %s3124_s13 }
0x1836   :  { %v2380_v63 = vpop.permute.xlu0 %2379 }
0x1837   :  { %v2382_v2 = vmul.f32 %v2993_v55, %v2380_v63 }
0x1839   :  { %v2392_v3 = vmul.f32 %v2390_v0, %v2382_v2 }
0x183b   :  { %2394 = vrot.lane.b32.xlu0 %v2392_v3, %s3125_s3 }
0x18ad   :  { %v2395_v4 = vpop.permute.xlu0 %2394 }
0x18ae   :  { %v2398_v7 = vsel %vm2397_vm3, %v2395_v4, 0.0 }
0x18af   :  { %2399 = vadd.xlane.f32.xlu1 %v2398_v7 }
0x1938   :  { %v2400_v11 = vpop.xlane.xlu1 %2399 }
0x1939   :  { %v2408_v12 = vadd.f32 %v2461_v10, %v2400_v11 }
0x193b   :  { %2410 = vst.msk [vmem:[%s3637_s9] sm:$0x3] %vm2409_vm4, %v2408_v12 }
0x193c   :  { %2415 = vsyncpa [#allocation5], 1 }
0x193d   :  { %2416 = vsyncpa [#allocation7], 1 }
0x193e   :  { %2417 = vsyncpa [#allocation10], 1 }

</bundles_post_ra>
